<compile_context>
chip_gen: v7x
topology: tpu7x:2x2x1
jax: 0.10.0
libtpu: 0.0.40
codegen_flags: <defaults>
</compile_context>

<pallas_src>
import math

import jax
import jax.numpy as jnp
from jax import lax
from jax.experimental import pallas as pl
from jax.experimental.pallas import tpu as pltpu

_LANE = 128
_NEG_INF = float("-inf")


def _elu(x):
    # ELU(alpha=1); clamp the exp argument so the unselected branch is finite.
    return jnp.where(x > 0, x, jnp.exp(jnp.minimum(x, 0.0)) - 1.0)


def _round_up(v, m):
    return (v + m - 1) // m * m


def _vmem_footprint_bytes(te, n, dim, g, pack):
    """Conservative per-step VMEM footprint model used to clamp the edge tile."""
    f32 = 4
    n_lanes = _round_up(max(n, 1), _LANE)
    d_lanes = _round_up(dim, _LANE)
    g_lanes = _round_up(max(g, 1), _LANE)
    atom_cols = dim if pack else d_lanes
    per_tile = te * f32 * (
        2 * _LANE           # idx block (te,3), lane-padded, double-buffered
        + 2 * atom_cols     # atom output block, double-buffered
        + 3 * n_lanes       # node iota + fused one-hot (+ compare temp)
        + 6 * d_lanes       # h_sum / atom / wsum / score / packing temporaries
        + 2 * g_lanes       # graph iota + graph one-hot
    )
    fixed = f32 * (
        _round_up(n, 8) * d_lanes          # resident h scratch
        + 6 * 8 * d_lanes                  # attn / w_r (and small param blocks)
        + 2 * _round_up(g, 8) * d_lanes    # sum accumulator (double-buffered)
        + 2 * max(g, 1) * 8 * d_lanes      # max accumulator (G,1,dim)
    )
    return per_tile + fixed


def line_evo_forward(x, edges, pos, batch, params, *, num_graphs, tile_e=1024,
                     vmem_budget_bytes=24 * 1024 * 1024):
    """LineEvoLayer.forward with if_pos=False (dropout = identity / eval)."""
    w, b, attn, w_r, b_r = params
    n, in_dim = x.shape
    dim = w.shape[1]
    e = edges.shape[0]
    g = int(num_graphs)

    # ---- tiny glue in XLA: index packing and the one-shot node projection ---
    src = edges[:, 0].astype(jnp.int32)
    dst = edges[:, 1].astype(jnp.int32)
    batch_e = jnp.take(batch.astype(jnp.int32), src, axis=0)           # [E]
    idx = jnp.stack([src, dst, batch_e], axis=1)                        # [E,3]
    # h = xW + b runs once, outside the edge loop; the kernel DMAs it into a
    # persistent VMEM scratch at pid==0 (frees the old double-buffered x).
    h_host = (x.astype(jnp.float32) @ w + b).astype(jnp.float32)        # [N,dim]

    # ---- lane-dense packing of the [*, dim] atom output ---------------------
    pack = (dim <= _LANE) and (_LANE % dim == 0)
    qpack = (_LANE // dim) if pack else 1
    row_align = 8 * qpack if pack else 8       # keeps packed block rows % 8 == 0

    # ---- VMEM-aware edge-tile size (safe on v5e/v6e/v7x) ---------------------
    te = _round_up(max(min(int(tile_e), max(e, 1)), 1), row_align)
    while te > row_align and _vmem_footprint_bytes(te, n, dim, g,
                                                   pack) > vmem_budget_bytes:
        te -= row_align
    e_pad = _round_up(max(e, 1), te)
    if e_pad != idx.shape[0]:
        idx = jnp.concatenate(
            [idx, jnp.zeros((e_pad - idx.shape[0], 3), jnp.int32)], 0)

    footprint = _vmem_footprint_bytes(te, n, dim, g, pack)
    vmem_limit = int(min(32 * 1024 * 1024, max(2 * footprint, 16 * 1024 * 1024)))

    w_r_row = w_r.reshape(1, dim)      # score weight as a lane-dense row
    b_r_s = b_r.reshape(1, 1)          # scalar bias -> SMEM

    grid = (e_pad // te,)
    pr = te // qpack if pack else te   # rows of one packed atom output block

    # TODO(synk): h is kept fully resident in VMEM (fine up to ~10^5 nodes at
    # dim=32); for huge graphs tile the node dimension / switch the one-hot
    # gather to a per-row DMA gather (one-hot cost scales O(te*N)).
    # TODO(synk): v7x dual-TensorCore split (leading size-2 "parallel" axis
    # with per-core accumulators) not implemented; single 'arbitrary' axis.
    def kernel(idx_ref, h_hbm, attn_ref, wr_ref, br_ref,
               atom_ref, sum_ref, max_ref, h_vmem):
        pid = pl.program_id(0)

        # ---- one-time init: DMA h into VMEM, zero the readout accumulators --
        @pl.when(pid == 0)
        def _init():
            pltpu.sync_copy(h_hbm, h_vmem)
            sum_ref[...] = jnp.zeros_like(sum_ref)
            max_ref[...] = jnp.full_like(max_ref, _NEG_INF)

        h = h_vmem[...]                                              # [N,dim]
        idx_t = idx_ref[...]                                         # [te,3]
        src_c = idx_t[:, 0:1]
        dst_c = idx_t[:, 1:2]
        be_c = idx_t[:, 2:3]

        # ---- fused one-hot gather: ONE MXU matmul gives h[src] + h[dst] -----
        # (coefficients in {0,1,2} -> exact in f32; indices assumed in [0,N))
        node_iota = lax.broadcasted_iota(jnp.int32, (te, n), 1)
        onehot2 = ((src_c == node_iota).astype(jnp.float32)
                   + (dst_c == node_iota).astype(jnp.float32))
        h_sum = jnp.dot(onehot2, h, preferred_element_type=jnp.float32)

        # ---- fused edge math (VPU/EUP) ---------------------------------------
        atom = _elu(_elu(h_sum) * attn_ref[...])                     # [te,dim]
        # sigmoid gate: lane reduction instead of an N=1 MXU matmul
        score = jax.nn.sigmoid(
            jnp.sum(atom * wr_ref[...], axis=-1, keepdims=True) + br_ref[0, 0])

        # ---- lane-dense atom store (review #3) -------------------------------
        if pack:
            rows = te // qpack
            atom_ref[...] = jnp.concatenate(
                [atom[j * rows:(j + 1) * rows, :] for j in range(qpack)],
                axis=1)                                              # [pr,128]
        else:
            atom_ref[...] = atom

        # ---- streaming readout accumulation ----------------------------------
        row = pid * te + lax.broadcasted_iota(jnp.int32, (te, 1), 0)
        valid = row < e                          # mask padded tail rows
        wsum = jnp.where(valid, atom * score, 0.0)                   # [te,dim]

        g_iota = lax.broadcasted_iota(jnp.int32, (te, g), 1)
        onehot_g = jnp.where(valid, (be_c == g_iota).astype(jnp.float32), 0.0)
        # [G,te] @ [te,dim] (trans_a) on the MXU
        sum_ref[...] += lax.dot_general(
            onehot_g, wsum, (((0,), (0,)), ((), ())),
            preferred_element_type=jnp.float32)

        # per-graph running max: loop (bounded live ranges) + dynamic row update
        masked_atom = jnp.where(valid, atom, _NEG_INF)

        @pl.loop(0, g)
        def _gmax(gi):
            tile_max = jnp.max(jnp.where(be_c == gi, masked_atom, _NEG_INF),
                               axis=0, keepdims=True)                # [1,dim]
            max_ref[gi] = jnp.maximum(max_ref[gi], tile_max)

        # ---- finalize: empty graphs max-pool to 0 ----------------------------
        @pl.when(pid == pl.num_programs(0) - 1)
        def _fin():
            mx = max_ref[...]
            max_ref[...] = jnp.where(mx == _NEG_INF, 0.0, mx)

    atom_out, sum_pool, max_out = pl.pallas_call(
        kernel,
        out_shape=(
            jax.ShapeDtypeStruct(
                (e_pad // qpack, _LANE) if pack else (e_pad, dim), jnp.float32),
            jax.ShapeDtypeStruct((g, dim), jnp.float32),       # weighted-sum pool
            jax.ShapeDtypeStruct((g, 1, dim), jnp.float32),    # max pool
        ),
        grid_spec=pltpu.PrefetchScalarGridSpec(
            num_scalar_prefetch=0,
            grid=grid,
            in_specs=[
                pl.BlockSpec((te, 3), lambda i: (i, 0)),            # edge indices
                pl.BlockSpec(memory_space=pl.ANY),                  # h in HBM
                pl.BlockSpec((1, dim), lambda i: (0, 0)),           # attn
                pl.BlockSpec((1, dim), lambda i: (0, 0)),           # w_r row
                pl.BlockSpec(memory_space=pltpu.MemorySpace.SMEM),  # b_r scalar
            ],
            out_specs=[
                pl.BlockSpec((pr, _LANE) if pack else (te, dim),
                             lambda i: (i, 0)),                     # atom slab
                pl.BlockSpec((g, dim), lambda i: (0, 0)),           # resident acc
                pl.BlockSpec((g, 1, dim), lambda i: (0, 0, 0)),     # resident acc
            ],
            scratch_shapes=[pltpu.VMEM((n, dim), jnp.float32)],     # h (VMEM)
        ),
        compiler_params=pltpu.CompilerParams(
            dimension_semantics=("arbitrary",),   # accumulators persist
            vmem_limit_bytes=vmem_limit,
        ),
    )(idx, h_host, attn, w_r_row, b_r_s)

    # ---- unpack the lane-dense atom slab back to [E, dim] -------------------
    if pack:
        ntiles = e_pad // te
        rows = te // qpack
        atom_pad = (atom_out.reshape(ntiles, rows, qpack, dim)
                    .transpose(0, 2, 1, 3).reshape(e_pad, dim))
    else:
        atom_pad = atom_out
    atom_repr = atom_pad[:e]

    # ReadoutPhase (canonical LineEvo readout: sigmoid-weighted sum || max)
    mol_repr = jnp.concatenate([sum_pool, max_out[:, 0, :]], axis=1)  # [G,2*dim]
    # TODO(synk): if_pos=True branch (RBFExpansion + linear_rbf) not implemented
    # (class definition not provided; default constructor has if_pos=False).
    return atom_repr, pos, batch_e, mol_repr


def _reference(x, edges, pos, batch, params, num_graphs):
    w, b, attn, w_r, b_r = params
    h = x @ w + b
    hs, hd = h[edges[:, 0]], h[edges[:, 1]]
    atom = _elu(_elu(hs + hd) * attn)
    score = jax.nn.sigmoid(atom @ w_r + b_r)
    batch_e = batch[edges[:, 0]]
    s = jax.ops.segment_sum(atom * score, batch_e, num_segments=num_graphs)
    cnt = jax.ops.segment_sum(jnp.ones((edges.shape[0], 1), jnp.float32),
                              batch_e, num_segments=num_graphs)
    m = jax.ops.segment_max(atom, batch_e, num_segments=num_graphs)
    m = jnp.where(cnt > 0, m, 0.0)                  # empty graph -> 0 (like kernel)
    return atom, pos, batch_e, jnp.concatenate([s, m], axis=1)


if __name__ == "__main__":
    N, IN_DIM, DIM, E, G = 16, 32, 32, 83, 3          # E not a multiple of the tile

    key = jax.random.PRNGKey(0)
    kx, kp, kw, ka, kr, kb = jax.random.split(key, 6)

    # --- deterministic parameter init (shapes per LineEvoLayer.__init__) ---
    a_lin = math.sqrt(6.0 / (IN_DIM + DIM))            # xavier_uniform
    w = jax.random.uniform(kw, (IN_DIM, DIM), jnp.float32, -a_lin, a_lin)
    b = jnp.zeros((1, DIM), jnp.float32)               # linear.bias = 0
    a_attn = math.sqrt(6.0 / (1 + DIM))
    attn = jax.random.uniform(ka, (1, DIM), jnp.float32, -a_attn, a_attn)
    bound = 1.0 / math.sqrt(DIM)                       # ReadoutPhase weighting
    w_r = jax.random.uniform(kr, (DIM, 1), jnp.float32, -bound, bound)
    b_r = jax.random.uniform(kb, (1, 1), jnp.float32, -bound, bound)
    params = (w, b, attn, w_r, b_r)

    # --- deterministic inputs ---
    x = jax.random.normal(kx, (N, IN_DIM), jnp.float32)
    pos = jax.random.normal(kp, (N, 3), jnp.float32)
    batch = jnp.array([0] * 6 + [1] * 5 + [2] * 5, dtype=jnp.int32)    # [N]
    src = jnp.arange(E, dtype=jnp.int32) % N                           # all graphs hit
    dst = (jnp.arange(E, dtype=jnp.int32) * 7 + 3) % N
    edges = jnp.stack([src, dst], axis=1)                              # [E, 2]

    ref_atom, ref_pos, ref_batch, ref_mol = _reference(
        x, edges, pos, batch, params, G)

    # large (clamped) tile -> single grid step; small tile -> multi-step
    # accumulation + masked tail (E=83 is not a multiple of 32).
    for tile in (1024, 32):
        atom_repr, pos_out, batch_e, mol_repr = jax.block_until_ready(
            line_evo_forward(x, edges, pos, batch, params,
                             num_graphs=G, tile_e=tile))
        assert atom_repr.shape == (E, DIM) and mol_repr.shape == (G, 2 * DIM)
        assert jnp.allclose(atom_repr, ref_atom, atol=1e-5, rtol=1e-5)
        assert jnp.allclose(mol_repr, ref_mol, atol=1e-4, rtol=1e-4)
        assert jnp.array_equal(batch_e, ref_batch)
        assert jnp.allclose(pos_out, ref_pos)

    print("KERNEL_OK")
</pallas_src>

<mosaic_0001>
module attributes {stable_mosaic.version = 11 : i64} {
  func.func @kernel(%arg0: i32, %arg1: memref<96x3xi32, #tpu.memory_space<vmem>>, %arg2: memref<16x32xf32, #tpu.memory_space<any>>, %arg3: memref<1x32xf32, #tpu.memory_space<vmem>>, %arg4: memref<1x32xf32, #tpu.memory_space<vmem>>, %arg5: memref<1x1xf32, #tpu.memory_space<smem>>, %arg6: memref<24x128xf32, #tpu.memory_space<vmem>>, %arg7: memref<3x32xf32, #tpu.memory_space<vmem>>, %arg8: memref<3x1x32xf32, #tpu.memory_space<vmem>>, %arg9: memref<16x32xf32, #tpu.memory_space<vmem>>) attributes {dimension_semantics = [#tpu.dimension_semantics<arbitrary>], iteration_bounds = array<i64: 1>, scalar_prefetch = 0 : i64, scratch_operands = 1 : i64, tpu.core_type = #tpu.core_type<tc>, window_params = [{transform_indices = @transform_0, window_bounds = array<i64: 96, 3>}, {}, {pipeline_mode = #tpu.pipeline_mode<synchronous>, transform_indices = @transform_2, window_bounds = array<i64: 1, 32>}, {pipeline_mode = #tpu.pipeline_mode<synchronous>, transform_indices = @transform_3, window_bounds = array<i64: 1, 32>}, {transform_indices = @transform_4, window_bounds = array<i64: 1, 1>}, {transform_indices = @transform_5, window_bounds = array<i64: 24, 128>}, {pipeline_mode = #tpu.pipeline_mode<synchronous>, transform_indices = @transform_6, window_bounds = array<i64: 3, 32>}, {pipeline_mode = #tpu.pipeline_mode<synchronous>, transform_indices = @transform_7, window_bounds = array<i64: 3, 1, 32>}]} {
    %c0_i32 = arith.constant 0 : i32
    %0 = arith.cmpi eq, %arg0, %c0_i32 : i32
    %1 = arith.extui %0 : i1 to i32
    %c0_i32_0 = arith.constant 0 : i32
    %2 = arith.cmpi ne, %1, %c0_i32_0 : i32
    scf.if %2 {
      "tpu.region"() ({
        %94 = tpu.sem_alloc : memref<!tpu.dma_semaphore, #tpu.memory_space<semaphore_mem>>
        tpu.enqueue_dma source(%arg2 : memref<16x32xf32, #tpu.memory_space<any>>) target(%arg9 : memref<16x32xf32, #tpu.memory_space<vmem>>) target_semaphore(%94 : memref<!tpu.dma_semaphore, #tpu.memory_space<semaphore_mem>>)
        tpu.wait_dma2 semaphore(%94 : memref<!tpu.dma_semaphore, #tpu.memory_space<semaphore_mem>>) src(%arg2 : memref<16x32xf32, #tpu.memory_space<any>>) dst(%arg9 : memref<16x32xf32, #tpu.memory_space<vmem>>)
        tpu.yield
      }) : () -> ()
      %cst_32 = arith.constant 0.000000e+00 : f32
      %90 = vector.broadcast %cst_32 : f32 to vector<3x32xf32>
      %c0_33 = arith.constant 0 : index
      %c0_34 = arith.constant 0 : index
      %91 = vector.load %arg7[%c0_33, %c0_34] : memref<3x32xf32, #tpu.memory_space<vmem>>, vector<3x32xf32>
      tpu.vector_store %arg7[%c0_33, %c0_34], %90 {strides = array<i32>} : memref<3x32xf32, #tpu.memory_space<vmem>>, vector<3x32xf32>,
      %cst_35 = arith.constant 0xFF800000 : f32
      %92 = vector.broadcast %cst_35 : f32 to vector<3x1x32xf32>
      %c0_36 = arith.constant 0 : index
      %c0_37 = arith.constant 0 : index
      %c0_38 = arith.constant 0 : index
      %93 = vector.load %arg8[%c0_36, %c0_37, %c0_38] : memref<3x1x32xf32, #tpu.memory_space<vmem>>, vector<3x1x32xf32>
      tpu.vector_store %arg8[%c0_36, %c0_37, %c0_38], %92 {strides = array<i32>} : memref<3x1x32xf32, #tpu.memory_space<vmem>>, vector<3x1x32xf32>,
    } else {
    }
    %c0 = arith.constant 0 : index
    %c0_1 = arith.constant 0 : index
    %3 = vector.load %arg9[%c0, %c0_1] : memref<16x32xf32, #tpu.memory_space<vmem>>, vector<16x32xf32>
    %c0_2 = arith.constant 0 : index
    %c0_3 = arith.constant 0 : index
    %4 = vector.load %arg1[%c0_2, %c0_3] : memref<96x3xi32, #tpu.memory_space<vmem>>, vector<96x3xi32>
    %5 = vector.extract_strided_slice %4 {offsets = [0, 0], sizes = [96, 1], strides = [1, 1]} : vector<96x3xi32> to vector<96x1xi32>
    %6 = vector.extract_strided_slice %4 {offsets = [0, 1], sizes = [96, 1], strides = [1, 1]} : vector<96x3xi32> to vector<96x1xi32>
    %7 = vector.extract_strided_slice %4 {offsets = [0, 2], sizes = [96, 1], strides = [1, 1]} : vector<96x3xi32> to vector<96x1xi32>
    %8 = tpu.iota {dimensions = array<i32: 1>} : vector<96x16xi32>
    %9 = vector.broadcast %5 : vector<96x1xi32> to vector<96x16xi32>
    %10 = arith.cmpi eq, %9, %8 : vector<96x16xi32>
    %11 = arith.extui %10 : vector<96x16xi1> to vector<96x16xi32>
    %12 = arith.sitofp %11 : vector<96x16xi32> to vector<96x16xf32>
    %13 = vector.broadcast %6 : vector<96x1xi32> to vector<96x16xi32>
    %14 = arith.cmpi eq, %13, %8 : vector<96x16xi32>
    %15 = arith.extui %14 : vector<96x16xi1> to vector<96x16xi32>
    %16 = arith.sitofp %15 : vector<96x16xi32> to vector<96x16xf32>
    %17 = arith.addf %12, %16 : vector<96x16xf32>
    %cst = arith.constant dense<0.000000e+00> : vector<96x32xf32>
    %18 = tpu.matmul %17, %3, %cst {dimension_numbers = #tpu.dot_dimension_numbers<[1], [0], [0], [1], [0, 0, 1, 1], [], []>} : vector<96x16xf32>, vector<16x32xf32>, vector<96x32xf32> -> vector<96x32xf32>
    %cst_4 = arith.constant 0.000000e+00 : f32
    %19 = vector.broadcast %cst_4 : f32 to vector<96x32xf32>
    %20 = arith.cmpf ogt, %18, %19 : vector<96x32xf32>
    %cst_5 = arith.constant 0.000000e+00 : f32
    %21 = vector.broadcast %cst_5 : f32 to vector<96x32xf32>
    %22 = arith.minimumf %18, %21 : vector<96x32xf32>
    %23 = math.exp %22 : vector<96x32xf32>
    %cst_6 = arith.constant 1.000000e+00 : f32
    %24 = vector.broadcast %cst_6 : f32 to vector<96x32xf32>
    %25 = arith.subf %23, %24 : vector<96x32xf32>
    %26 = arith.select %20, %18, %25 : vector<96x32xi1>, vector<96x32xf32>
    %c0_7 = arith.constant 0 : index
    %c0_8 = arith.constant 0 : index
    %27 = vector.load %arg3[%c0_7, %c0_8] : memref<1x32xf32, #tpu.memory_space<vmem>>, vector<1x32xf32>
    %28 = vector.broadcast %27 : vector<1x32xf32> to vector<96x32xf32>
    %29 = arith.mulf %26, %28 : vector<96x32xf32>
    %cst_9 = arith.constant 0.000000e+00 : f32
    %30 = vector.broadcast %cst_9 : f32 to vector<96x32xf32>
    %31 = arith.cmpf ogt, %29, %30 : vector<96x32xf32>
    %cst_10 = arith.constant 0.000000e+00 : f32
    %32 = vector.broadcast %cst_10 : f32 to vector<96x32xf32>
    %33 = arith.minimumf %29, %32 : vector<96x32xf32>
    %34 = math.exp %33 : vector<96x32xf32>
    %cst_11 = arith.constant 1.000000e+00 : f32
    %35 = vector.broadcast %cst_11 : f32 to vector<96x32xf32>
    %36 = arith.subf %34, %35 : vector<96x32xf32>
    %37 = arith.select %31, %29, %36 : vector<96x32xi1>, vector<96x32xf32>
    %c0_12 = arith.constant 0 : index
    %c0_13 = arith.constant 0 : index
    %38 = vector.load %arg4[%c0_12, %c0_13] : memref<1x32xf32, #tpu.memory_space<vmem>>, vector<1x32xf32>
    %39 = vector.broadcast %38 : vector<1x32xf32> to vector<96x32xf32>
    %40 = arith.mulf %37, %39 : vector<96x32xf32>
    %cst_14 = arith.constant dense<0.000000e+00> : vector<96xf32>
    %41 = vector.multi_reduction <add>, %40, %cst_14 [1] : vector<96x32xf32> to vector<96xf32>
    %42 = vector.shape_cast %41 : vector<96xf32> to vector<96x1xf32>
    %c0_15 = arith.constant 0 : index
    %c0_16 = arith.constant 0 : index
    %43 = memref.load %arg5[%c0_15, %c0_16] : memref<1x1xf32, #tpu.memory_space<smem>>
    %44 = vector.broadcast %43 : f32 to vector<96x1xf32>
    %45 = arith.addf %42, %44 : vector<96x1xf32>
    %46 = arith.negf %45 : vector<96x1xf32>
    %47 = math.exp %46 : vector<96x1xf32>
    %cst_17 = arith.constant 1.000000e+00 : f32
    %48 = vector.broadcast %cst_17 : f32 to vector<96x1xf32>
    %49 = arith.addf %48, %47 : vector<96x1xf32>
    %50 = arith.divf %48, %49 : vector<96x1xf32>
    %51 = vector.extract_strided_slice %37 {offsets = [0, 0], sizes = [24, 32], strides = [1, 1]} : vector<96x32xf32> to vector<24x32xf32>
    %52 = vector.extract_strided_slice %37 {offsets = [24, 0], sizes = [24, 32], strides = [1, 1]} : vector<96x32xf32> to vector<24x32xf32>
    %53 = vector.extract_strided_slice %37 {offsets = [48, 0], sizes = [24, 32], strides = [1, 1]} : vector<96x32xf32> to vector<24x32xf32>
    %54 = vector.extract_strided_slice %37 {offsets = [72, 0], sizes = [24, 32], strides = [1, 1]} : vector<96x32xf32> to vector<24x32xf32>
    %55 = tpu.concatenate %51, %52, %53, %54 in 1 : vector<24x32xf32>, vector<24x32xf32>, vector<24x32xf32>, vector<24x32xf32> -> vector<24x128xf32>
    %c0_18 = arith.constant 0 : index
    %c0_19 = arith.constant 0 : index
    %56 = vector.load %arg6[%c0_18, %c0_19] : memref<24x128xf32, #tpu.memory_space<vmem>>, vector<24x128xf32>
    tpu.vector_store %arg6[%c0_18, %c0_19], %55 {strides = array<i32>} : memref<24x128xf32, #tpu.memory_space<vmem>>, vector<24x128xf32>,
    %c96_i32 = arith.constant 96 : i32
    %57 = arith.muli %arg0, %c96_i32 : i32
    %58 = tpu.iota {dimensions = array<i32: 0>} : vector<96x1xi32>
    %59 = vector.broadcast %57 : i32 to vector<96x1xi32>
    %60 = arith.addi %59, %58 : vector<96x1xi32>
    %c83_i32 = arith.constant 83 : i32
    %61 = vector.broadcast %c83_i32 : i32 to vector<96x1xi32>
    %62 = arith.cmpi slt, %60, %61 : vector<96x1xi32>
    %63 = vector.broadcast %50 : vector<96x1xf32> to vector<96x32xf32>
    %64 = arith.mulf %37, %63 : vector<96x32xf32>
    %cst_20 = arith.constant 0.000000e+00 : f32
    %65 = vector.shape_cast %62 : vector<96x1xi1> to vector<96x1xi1>
    %66 = vector.broadcast %65 : vector<96x1xi1> to vector<96x32xi1>
    %67 = vector.broadcast %cst_20 : f32 to vector<96x32xf32>
    %68 = arith.select %66, %64, %67 : vector<96x32xi1>, vector<96x32xf32>
    %69 = tpu.iota {dimensions = array<i32: 1>} : vector<96x3xi32>
    %70 = vector.broadcast %7 : vector<96x1xi32> to vector<96x3xi32>
    %71 = arith.cmpi eq, %70, %69 : vector<96x3xi32>
    %72 = arith.extui %71 : vector<96x3xi1> to vector<96x3xi32>
    %73 = arith.sitofp %72 : vector<96x3xi32> to vector<96x3xf32>
    %cst_21 = arith.constant 0.000000e+00 : f32
    %74 = vector.shape_cast %62 : vector<96x1xi1> to vector<96x1xi1>
    %75 = vector.broadcast %74 : vector<96x1xi1> to vector<96x3xi1>
    %76 = vector.broadcast %cst_21 : f32 to vector<96x3xf32>
    %77 = arith.select %75, %73, %76 : vector<96x3xi1>, vector<96x3xf32>
    %c0_22 = arith.constant 0 : index
    %c0_23 = arith.constant 0 : index
    %78 = vector.load %arg7[%c0_22, %c0_23] : memref<3x32xf32, #tpu.memory_space<vmem>>, vector<3x32xf32>
    %cst_24 = arith.constant dense<0.000000e+00> : vector<3x32xf32>
    %79 = tpu.matmul %77, %68, %cst_24 {dimension_numbers = #tpu.dot_dimension_numbers<[0], [0], [1], [1], [0, 1, 1, 1], [], []>} : vector<96x3xf32>, vector<96x32xf32>, vector<3x32xf32> -> vector<3x32xf32>
    %80 = arith.addf %78, %79 : vector<3x32xf32>
    %c0_25 = arith.constant 0 : index
    %c0_26 = arith.constant 0 : index
    %81 = vector.load %arg7[%c0_25, %c0_26] : memref<3x32xf32, #tpu.memory_space<vmem>>, vector<3x32xf32>
    tpu.vector_store %arg7[%c0_25, %c0_26], %80 {strides = array<i32>} : memref<3x32xf32, #tpu.memory_space<vmem>>, vector<3x32xf32>,
    %cst_27 = arith.constant 0xFF800000 : f32
    %82 = vector.shape_cast %62 : vector<96x1xi1> to vector<96x1xi1>
    %83 = vector.broadcast %82 : vector<96x1xi1> to vector<96x32xi1>
    %84 = vector.broadcast %cst_27 : f32 to vector<96x32xf32>
    %85 = arith.select %83, %37, %84 : vector<96x32xi1>, vector<96x32xf32>
    %c0_i32_28 = arith.constant 0 : i32
    %c3_i32 = arith.constant 3 : i32
    %86 = arith.addi %c0_i32_28, %c3_i32 : i32
    %c1_i32 = arith.constant 1 : i32
    scf.for %arg10 = %c0_i32_28 to %86 step %c1_i32  : i32 {
      %c1_i32_32 = arith.constant 1 : i32
      %90 = arith.muli %arg10, %c1_i32_32 : i32
      %c0_i32_33 = arith.constant 0 : i32
      %91 = arith.addi %c0_i32_33, %90 : i32
      %92 = vector.broadcast %91 : i32 to vector<96x1xi32>
      %93 = arith.cmpi eq, %7, %92 : vector<96x1xi32>
      %cst_34 = arith.constant 0xFF800000 : f32
      %94 = vector.shape_cast %93 : vector<96x1xi1> to vector<96x1xi1>
      %95 = vector.broadcast %94 : vector<96x1xi1> to vector<96x32xi1>
      %96 = vector.broadcast %cst_34 : f32 to vector<96x32xf32>
      %97 = arith.select %95, %85, %96 : vector<96x32xi1>, vector<96x32xf32>
      %cst_35 = arith.constant dense<0xFF800000> : vector<32xf32>
      %98 = vector.multi_reduction <maximumf>, %97, %cst_35 [0] : vector<96x32xf32> to vector<32xf32>
      %99 = vector.shape_cast %98 : vector<32xf32> to vector<1x32xf32>
      %100 = arith.index_cast %91 : i32 to index
      %c0_36 = arith.constant 0 : index
      %c0_37 = arith.constant 0 : index
      %101 = vector.load %arg8[%100, %c0_36, %c0_37] : memref<3x1x32xf32, #tpu.memory_space<vmem>>, vector<1x1x32xf32>
      %102 = vector.shape_cast %101 : vector<1x1x32xf32> to vector<1x32xf32>
      %103 = arith.maximumf %102, %99 : vector<1x32xf32>
      %104 = arith.index_cast %91 : i32 to index
      %c0_38 = arith.constant 0 : index
      %c0_39 = arith.constant 0 : index
      %105 = vector.load %arg8[%104, %c0_38, %c0_39] : memref<3x1x32xf32, #tpu.memory_space<vmem>>, vector<1x1x32xf32>
      %106 = vector.shape_cast %105 : vector<1x1x32xf32> to vector<1x32xf32>
      %107 = vector.shape_cast %103 : vector<1x32xf32> to vector<1x1x32xf32>
      tpu.vector_store %arg8[%104, %c0_38, %c0_39], %107 {strides = array<i32>} : memref<3x1x32xf32, #tpu.memory_space<vmem>>, vector<1x1x32xf32>,
    }
    %c3_i32_29 = arith.constant 3 : i32
    %c0_i32_30 = arith.constant 0 : i32
    %87 = arith.cmpi eq, %arg0, %c0_i32_30 : i32
    %88 = arith.extui %87 : i1 to i32
    %c0_i32_31 = arith.constant 0 : i32
    %89 = arith.cmpi ne, %88, %c0_i32_31 : i32
    scf.if %89 {
      %c0_32 = arith.constant 0 : index
      %c0_33 = arith.constant 0 : index
      %c0_34 = arith.constant 0 : index
      %90 = vector.load %arg8[%c0_32, %c0_33, %c0_34] : memref<3x1x32xf32, #tpu.memory_space<vmem>>, vector<3x1x32xf32>
      %cst_35 = arith.constant 0xFF800000 : f32
      %91 = vector.broadcast %cst_35 : f32 to vector<3x1x32xf32>
      %92 = arith.cmpf oeq, %90, %91 : vector<3x1x32xf32>
      %cst_36 = arith.constant 0.000000e+00 : f32
      %93 = vector.broadcast %cst_36 : f32 to vector<3x1x32xf32>
      %94 = arith.select %92, %93, %90 : vector<3x1x32xi1>, vector<3x1x32xf32>
      %c0_37 = arith.constant 0 : index
      %c0_38 = arith.constant 0 : index
      %c0_39 = arith.constant 0 : index
      %95 = vector.load %arg8[%c0_37, %c0_38, %c0_39] : memref<3x1x32xf32, #tpu.memory_space<vmem>>, vector<3x1x32xf32>
      tpu.vector_store %arg8[%c0_37, %c0_38, %c0_39], %94 {strides = array<i32>} : memref<3x1x32xf32, #tpu.memory_space<vmem>>, vector<3x1x32xf32>,
    } else {
    }
    return
  }
  func.func @transform_0(%arg0: i32) -> (i32, i32) {
    %c0_i32 = arith.constant 0 : i32
    %c0_i32_0 = arith.constant 0 : i32
    return %arg0, %c0_i32 : i32, i32
  }
  func.func @transform_2(%arg0: i32) -> (i32, i32) {
    %c0_i32 = arith.constant 0 : i32
    %c0_i32_0 = arith.constant 0 : i32
    %c0_i32_1 = arith.constant 0 : i32
    return %c0_i32, %c0_i32_0 : i32, i32
  }
  func.func @transform_3(%arg0: i32) -> (i32, i32) {
    %c0_i32 = arith.constant 0 : i32
    %c0_i32_0 = arith.constant 0 : i32
    %c0_i32_1 = arith.constant 0 : i32
    return %c0_i32, %c0_i32_0 : i32, i32
  }
  func.func @transform_4(%arg0: i32) -> (i32, i32) {
    %c0_i32 = arith.constant 0 : i32
    %c0_i32_0 = arith.constant 0 : i32
    %c0_i32_1 = arith.constant 0 : i32
    return %c0_i32, %c0_i32_0 : i32, i32
  }
  func.func @transform_5(%arg0: i32) -> (i32, i32) {
    %c0_i32 = arith.constant 0 : i32
    %c0_i32_0 = arith.constant 0 : i32
    return %arg0, %c0_i32 : i32, i32
  }
  func.func @transform_6(%arg0: i32) -> (i32, i32) {
    %c0_i32 = arith.constant 0 : i32
    %c0_i32_0 = arith.constant 0 : i32
    %c0_i32_1 = arith.constant 0 : i32
    return %c0_i32, %c0_i32_0 : i32, i32
  }
  func.func @transform_7(%arg0: i32) -> (i32, i32, i32) {
    %c0_i32 = arith.constant 0 : i32
    %c0_i32_0 = arith.constant 0 : i32
    %c0_i32_1 = arith.constant 0 : i32
    %c0_i32_2 = arith.constant 0 : i32
    return %c0_i32, %c0_i32_0, %c0_i32_1 : i32, i32, i32
  }
}

</mosaic_0001>

<bundles_post_ra>
// kernel: tpu_custom_call.1
= control target key start
LH: loop header
LB: loop body
LE: loop exit
PB: predicated region body
PF: predicated region fallthrough
CT: control target
= control target key end

     0   :  { %14 = vsyncpa [#allocation5], 0  ;;  %s2207_s0 = inlined_call_operand.vmem [shape: s32[96,3], index: 0, kind: input, shape index: {}]   ;;  %s2208_s1 = inlined_call_operand.vmem [shape: f32[16,32], index: 1, kind: input, shape index: {}]   ;;  %s2209_s2 = inlined_call_operand.vmem [shape: f32[1,32], index: 2, kind: input, shape index: {}]   ;;  %s2210_s3 = inlined_call_operand.vmem [shape: f32[1,32], index: 3, kind: input, shape index: {}]   ;;  %s2211_s4 = inlined_call_operand.<no memory space> [shape: f32[1,1], index: 4, kind: input, shape index: {}]   ;;  %s2212_s5 = inlined_call_operand.hbm [shape: f32[24,128], index: 5, kind: output, shape index: {0}]   ;;  %s2213_s6 = inlined_call_operand.hbm [shape: f32[3,32], index: 6, kind: output, shape index: {1}]   ;;  %s2214_s7 = inlined_call_operand.hbm [shape: f32[3,1,32], index: 7, kind: output, shape index: {2}]  }
   0x1   :  { %15 = vsyncpa [#allocation7], 0 }
   0x2   :  { %v60_v0 = vld [vmem:[%s2208_s1] sm:$0xff]  ;;  %v62_v1 = vld [vmem:[%s2208_s1 + $0x8] sm:$0xff] }
   0x3   :  { %71 = vsyncadd [#allocation9], 256 }
   0x4   :  { %1640 = dma.done.wait [#allocation9], 256 }
   0x5   :  { %1641 = vsyncadd [#allocation9], 4294967040  ;;  %v1718_v2 = vld [vmem:[%s2207_s0 + $0x8] sm:$0xff]  ;;  %v1723_v3 = vld [vmem:[%s2207_s0] sm:$0xff]  ;;  %v1650_v4 = vmov 0   ;;  %v1651_v5 = vmov 1   ;;  %v1423_v6 = vpack.c.bf16 %v62_v1, %v60_v0  ;;  %v95_v19 = vlaneseq }
   0x6   :  { %1471 = vset.pattern.permute.xlu1 %v1650_v4  ;;  %1469 = vset.pattern.permute.xlu0 %v1650_v4  ;;  %v1732_v7 = vld [vmem:[%s2207_s0 + $0x10] sm:$0xff]  ;;  %vm77_vm0 = vcmask 253952   ;;  %v1652_v8 = vmov -inf   ;;  %v1742_v9 = vld [vmem:[%s2207_s0 + $0x18] sm:$0xff]  ;;  %v1749_v10 = vld [vmem:[%s2207_s0 + $0x20] sm:$0xff]  ;;  %v1653_v18 = vmov 2  }
   0x7   :  { %101 = vperm.xlu1 %1471, %v1718_v2   ;;  %98 = vperm.xlu0 %1469, %v1723_v3   ;;  %78 = vst.msk [vmem:[#allocation8] sm:$0x1] %vm77_vm0, %v1652_v8  ;;  %79 = vst.msk [vmem:[#allocation8 + $0x1] sm:$0x1] %vm77_vm0, %v1652_v8  ;;  %v1756_v11 = vld [vmem:[%s2207_s0 + $0x28] sm:$0xff]  ;;  %v1763_v12 = vld [vmem:[%s2207_s0 + $0x30] sm:$0xff] }
   0x8   :  { %1424 = vmatprep.subr.bf16.mxu0 %v1423_v6  ;;  %80 = vst.msk [vmem:[#allocation8 + $0x2] sm:$0x1] %vm77_vm0, %v1652_v8  ;;  %v1770_v13 = vld [vmem:[%s2207_s0 + $0x38] sm:$0xff]  ;;  %v1777_v14 = vld [vmem:[%s2207_s0 + $0x40] sm:$0xff]  ;;  %v1784_v15 = vld [vmem:[%s2207_s0 + $0x48] sm:$0xff]  ;;  %v1808_v20 = vand.u32 127, %v95_v19 }
   0x9   :  { %1426 = vmatpush3.bf16.msra.mxu0 %v1423_v6  ;;  %v1791_v16 = vld [vmem:[%s2207_s0 + $0x50] sm:$0xff]  ;;  %v94_v17 = vld [vmem:[%s2207_s0 + $0x58] sm:$0xff]  ;;  %vm253_vm5 = vcmask 130048   ;;  %v1654_v25 = vmov 0.0   ;;  %s1657_s30 = smov 64   ;;  %s1658_s8 = smov 96  }
   0xb   :  { %1472 = vset.pattern.permute.xlu1 %v1651_v5  ;;  %1470 = vset.pattern.permute.xlu0 %v1651_v5 }
   0xc   :  { %173 = vperm.xlu1 %1472, %v1718_v2   ;;  %170 = vperm.xlu0 %1470, %v1723_v3  }
  0x10   :  { %1473 = vset.pattern.permute.xlu1 %v1650_v4  ;;  %176 = vperm.xlu0 %1470, %v1732_v7  }
  0x11   :  { %104 = vperm.xlu1 %1473, %v1732_v7  }
  0x14   :  { %179 = vperm.xlu0 %1470, %v1742_v9  }
  0x15   :  { %107 = vperm.xlu1 %1473, %v1742_v9  }
  0x18   :  { %182 = vperm.xlu0 %1470, %v1749_v10  }
  0x19   :  { %110 = vperm.xlu1 %1473, %v1749_v10  }
  0x1c   :  { %185 = vperm.xlu0 %1470, %v1756_v11  }
  0x1d   :  { %113 = vperm.xlu1 %1473, %v1756_v11  }
  0x20   :  { %188 = vperm.xlu0 %1470, %v1763_v12  }
  0x21   :  { %116 = vperm.xlu1 %1473, %v1763_v12  }
  0x24   :  { %191 = vperm.xlu0 %1470, %v1770_v13  }
  0x25   :  { %119 = vperm.xlu1 %1473, %v1770_v13  }
  0x28   :  { %194 = vperm.xlu0 %1470, %v1777_v14  }
  0x29   :  { %122 = vperm.xlu1 %1473, %v1777_v14  }
  0x2c   :  { %197 = vperm.xlu0 %1470, %v1784_v15  }
  0x2d   :  { %125 = vperm.xlu1 %1473, %v1784_v15  }
  0x30   :  { %200 = vperm.xlu0 %1470, %v1791_v16  }
  0x31   :  { %128 = vperm.xlu1 %1473, %v1791_v16  }
  0x34   :  { %203 = vperm.xlu0 %1470, %v94_v17  }
  0x35   :  { %131 = vperm.xlu1 %1473, %v94_v17  }
  0x38   :  { %1474 = vset.pattern.permute.xlu0 %v1653_v18 }
  0x39   :  { %1475 = vset.pattern.permute.xlu1 %v1653_v18  ;;  %858 = vperm.xlu0 %1474, %v1723_v3  }
  0x3a   :  { %861 = vperm.xlu1 %1475, %v1718_v2  }
  0x3d   :  { %870 = vperm.xlu0 %1474, %v1749_v10  }
  0x3e   :  { %864 = vperm.xlu1 %1475, %v1732_v7  }
  0x41   :  { %876 = vperm.xlu0 %1474, %v1763_v12  }
  0x42   :  { %867 = vperm.xlu1 %1475, %v1742_v9  }
  0x45   :  { %882 = vperm.xlu0 %1474, %v1777_v14  }
  0x46   :  { %873 = vperm.xlu1 %1475, %v1756_v11  }
  0x4a   :  { %879 = vperm.xlu1 %1475, %v1770_v13  }
  0x86   :  { %v102_v21 = vpop.permute.xlu1 %101  ;;  %v99_v22 = vpop.permute.xlu0 %98 }
  0x87   :  { %vm134_vm1 = vcmp.eq.s32.totalorder %v102_v21, %v1808_v20  ;;  %vm133_vm2 = vcmp.eq.s32.totalorder %v99_v22, %v1808_v20 }
  0x88   :  { %v1263_v26 = vsel %vm134_vm1, 1.0, %v1654_v25  ;;  %v1262_v27 = vsel %vm133_vm2, 1.0, %v1654_v25 }
  0x8b   :  { %v174_v23 = vpop.permute.xlu1 %173  ;;  %v171_v24 = vpop.permute.xlu0 %170 }
  0x8c   :  { %vm206_vm3 = vcmp.eq.s32.totalorder %v174_v23, %v1808_v20  ;;  %vm205_vm4 = vcmp.eq.s32.totalorder %v171_v24, %v1808_v20 }
  0x8d   :  { %v1275_v28 = vsel %vm206_vm3, 1.0, %v1654_v25  ;;  %v1274_v29 = vsel %vm205_vm4, 1.0, %v1654_v25 }
  0x8e   :  { %v242_v30 = vadd.f32 %v1275_v28, %v1263_v26  ;;  %v241_v31 = vadd.f32 %v1274_v29, %v1262_v27 }
  0x8f   :  { %v177_v32 = vpop.permute.xlu0 %176 }
  0x90   :  { %vm207_vm6 = vcmp.eq.s32.totalorder %v177_v32, %v1808_v20  ;;  %v105_v33 = vpop.permute.xlu1 %104  ;;  %1380 = vmatprep.mubr.msk.f32.mxu0 %vm253_vm5, %v241_v31 }
  0x91   :  { %v1276_v34 = vsel %vm207_vm6, 1.0, %v1654_v25  ;;  %vm135_vm7 = vcmp.eq.s32.totalorder %v105_v33, %v1808_v20  ;;  %1381 = vmatmul.mubr.msk.f32.vlgmr.msra.gmra.mrb[0].mxu0 %vm253_vm5, %v242_v30 }
  0x92   :  { %v1264_v35 = vsel %vm135_vm7, 1.0, %v1654_v25 }
  0x93   :  { %v243_v36 = vadd.f32 %v1276_v34, %v1264_v35  ;;  %v180_v37 = vpop.permute.xlu0 %179 }
  0x94   :  { %vm208_vm8 = vcmp.eq.s32.totalorder %v180_v37, %v1808_v20  ;;  %v108_v38 = vpop.permute.xlu1 %107 }
  0x95   :  { %v1277_v39 = vsel %vm208_vm8, 1.0, %v1654_v25  ;;  %vm136_vm9 = vcmp.eq.s32.totalorder %v108_v38, %v1808_v20  ;;  %1383 = vmatprep.mubr.msk.f32.mxu0 %vm253_vm5, %v243_v36 }
  0x96   :  { %v1265_v40 = vsel %vm136_vm9, 1.0, %v1654_v25 }
  0x97   :  { %v244_v41 = vadd.f32 %v1277_v39, %v1265_v40  ;;  %v183_v42 = vpop.permute.xlu0 %182 }
  0x98   :  { %vm209_vm10 = vcmp.eq.s32.totalorder %v183_v42, %v1808_v20  ;;  %v111_v43 = vpop.permute.xlu1 %110 }
  0x99   :  { %v1278_v44 = vsel %vm209_vm10, 1.0, %v1654_v25  ;;  %vm137_vm11 = vcmp.eq.s32.totalorder %v111_v43, %v1808_v20  ;;  %1384 = vmatmul.mubr.msk.f32.gmra.mrb[2].mxu0 %vm253_vm5, %v244_v41 }
  0x9a   :  { %v1266_v45 = vsel %vm137_vm11, 1.0, %v1654_v25 }
  0x9b   :  { %v245_v46 = vadd.f32 %v1278_v44, %v1266_v45  ;;  %v186_v47 = vpop.permute.xlu0 %185 }
  0x9c   :  { %vm210_vm12 = vcmp.eq.s32.totalorder %v186_v47, %v1808_v20  ;;  %v114_v48 = vpop.permute.xlu1 %113  ;;  %v1873_v47 = vld [vmem:[%s2209_s2] ss:$0 sm:$0xff] }
  0x9d   :  { %v1279_v49 = vsel %vm210_vm12, 1.0, %v1654_v25  ;;  %vm138_vm13 = vcmp.eq.s32.totalorder %v114_v48, %v1808_v20  ;;  %1386 = vmatprep.mubr.msk.f32.mxu0 %vm253_vm5, %v245_v46 }
  0x9e   :  { %v1267_v50 = vsel %vm138_vm13, 1.0, %v1654_v25 }
  0x9f   :  { %v246_v51 = vadd.f32 %v1279_v49, %v1267_v50  ;;  %v189_v52 = vpop.permute.xlu0 %188 }
  0xa0   :  { %vm211_vm14 = vcmp.eq.s32.totalorder %v189_v52, %v1808_v20  ;;  %v117_v53 = vpop.permute.xlu1 %116 }
  0xa1   :  { %v1280_v54 = vsel %vm211_vm14, 1.0, %v1654_v25  ;;  %vm139_vm15 = vcmp.eq.s32.totalorder %v117_v53, %v1808_v20  ;;  %1387 = vmatmul.mubr.msk.f32.gmra.mrb[4].mxu0 %vm253_vm5, %v246_v51 }
  0xa2   :  { %v1268_v55 = vsel %vm139_vm15, 1.0, %v1654_v25 }
  0xa3   :  { %v247_v56 = vadd.f32 %v1280_v54, %v1268_v55  ;;  %v192_v57 = vpop.permute.xlu0 %191 }
  0xa4   :  { %vm212_vm1 = vcmp.eq.s32.totalorder %v192_v57, %v1808_v20  ;;  %v120_v58 = vpop.permute.xlu1 %119 }
  0xa5   :  { %v1281_v59 = vsel %vm212_vm1, 1.0, %v1654_v25  ;;  %vm140_vm2 = vcmp.eq.s32.totalorder %v120_v58, %v1808_v20  ;;  %1389 = vmatprep.mubr.msk.f32.mxu0 %vm253_vm5, %v247_v56 }
  0xa6   :  { %v1269_v60 = vsel %vm140_vm2, 1.0, %v1654_v25 }
  0xa7   :  { %v248_v61 = vadd.f32 %v1281_v59, %v1269_v60  ;;  %v195_v62 = vpop.permute.xlu0 %194 }
  0xa8   :  { %vm213_vm3 = vcmp.eq.s32.totalorder %v195_v62, %v1808_v20  ;;  %v123_v63 = vpop.permute.xlu1 %122 }
  0xa9   :  { %v1282_v0 = vsel %vm213_vm3, 1.0, %v1654_v25  ;;  %vm141_vm4 = vcmp.eq.s32.totalorder %v123_v63, %v1808_v20  ;;  %1390 = vmatmul.mubr.msk.f32.gmra.mrb[6].mxu0 %vm253_vm5, %v248_v61 }
  0xaa   :  { %v1270_v1 = vsel %vm141_vm4, 1.0, %v1654_v25  ;;  %vm597_vm4 = vcmask 261120  }
  0xab   :  { %v249_v4 = vadd.f32 %v1282_v0, %v1270_v1  ;;  %v198_v5 = vpop.permute.xlu0 %197 }
  0xac   :  { %vm214_vm6 = vcmp.eq.s32.totalorder %v198_v5, %v1808_v20  ;;  %v126_v6 = vpop.permute.xlu1 %125 }
  0xad   :  { %v1283_v8 = vsel %vm214_vm6, 1.0, %v1654_v25  ;;  %vm142_vm7 = vcmp.eq.s32.totalorder %v126_v6, %v1808_v20  ;;  %1392 = vmatprep.mubr.msk.f32.mxu0 %vm253_vm5, %v249_v4 }
  0xae   :  { %v1271_v17 = vsel %vm142_vm7, 1.0, %v1654_v25 }
  0xaf   :  { %v250_v18 = vadd.f32 %v1283_v8, %v1271_v17  ;;  %v201_v21 = vpop.permute.xlu0 %200 }
  0xb0   :  { %vm215_vm8 = vcmp.eq.s32.totalorder %v201_v21, %v1808_v20  ;;  %v129_v22 = vpop.permute.xlu1 %128 }
  0xb1   :  { %v1284_v23 = vsel %vm215_vm8, 1.0, %v1654_v25  ;;  %vm143_vm9 = vcmp.eq.s32.totalorder %v129_v22, %v1808_v20  ;;  %1393 = vmatmul.mubr.msk.f32.gmra.mrb[8].mxu0 %vm253_vm5, %v250_v18 }
  0xb2   :  { %v1272_v24 = vsel %vm143_vm9, 1.0, %v1654_v25 }
  0xb3   :  { %v251_v26 = vadd.f32 %v1284_v23, %v1272_v24  ;;  %v204_v27 = vpop.permute.xlu0 %203 }
  0xb4   :  { %vm216_vm10 = vcmp.eq.s32.totalorder %v204_v27, %v1808_v20  ;;  %v132_v28 = vpop.permute.xlu1 %131 }
  0xb5   :  { %v1285_v29 = vsel %vm216_vm10, 1.0, %v1654_v25  ;;  %vm144_vm11 = vcmp.eq.s32.totalorder %v132_v28, %v1808_v20  ;;  %1395 = vmatprep.mubr.msk.f32.mxu0 %vm253_vm5, %v251_v26 }
  0xb6   :  { %v1273_v30 = vsel %vm144_vm11, 1.0, %v1654_v25 }
  0xb7   :  { %v252_v31 = vadd.f32 %v1285_v29, %v1273_v30 }
  0xb9   :  { %1396 = vmatmul.mubr.msk.f32.gmra.mrb[10].mxu0 %vm253_vm5, %v252_v31 }
 0x164   :  { %v1382_v32 = vpop.f32.mrb[0].mxu0 }
 0x165   :  { %v428_v33 = vmin.f32 %v1382_v32, 0.0  ;;  %v356_v34 = vpop.f32.mrb[1].mxu0  ;;  %vm416_vm5 = vcmp.gt.f32.partialorder %v1382_v32, 0.0 }
 0x166   :  { %v427_v35 = vmin.f32 %v356_v34, 0.0  ;;  %vm415_vm12 = vcmp.gt.f32.partialorder %v356_v34, 0.0 }
 0x167   :  { %v441_v36 = vmul.f32 1.442695, %v428_v33 }
 0x168   :  { %v439_v37 = vmul.f32 1.442695, %v427_v35 }
 0x169   :  { %1476 = vpow2.f32 %v441_v36 }
 0x16a   :  { %1478 = vpow2.f32 %v439_v37 }
 0x16c   :  { %v1385_v38 = vpop.f32.mrb[2].mxu0 }
 0x16d   :  { %v430_v39 = vmin.f32 %v1385_v38, 0.0  ;;  %v366_v40 = vpop.f32.mrb[3].mxu0  ;;  %vm418_vm13 = vcmp.gt.f32.partialorder %v1385_v38, 0.0 }
 0x16e   :  { %v429_v41 = vmin.f32 %v366_v40, 0.0  ;;  %vm417_vm14 = vcmp.gt.f32.partialorder %v366_v40, 0.0 }
 0x16f   :  { %v445_v42 = vmul.f32 1.442695, %v430_v39 }
 0x170   :  { %v443_v43 = vmul.f32 1.442695, %v429_v41 }
 0x171   :  { %1480 = vpow2.f32 %v445_v42 }
 0x172   :  { %1482 = vpow2.f32 %v443_v43 }
 0x173   :  { %v1477_v44 = vpop.eup %1476 }
 0x174   :  { %v1479_v45 = vpop.eup %1478  ;;  %v1299_v46 = vadd.f32 -1.0, %v1477_v44  ;;  %v1388_v48 = vpop.f32.mrb[4].mxu0 }
 0x175   :  { %v1298_v49 = vadd.f32 -1.0, %v1479_v45  ;;  %v432_v50 = vmin.f32 %v1388_v48, 0.0  ;;  %v376_v51 = vpop.f32.mrb[5].mxu0  ;;  %vm420_vm15 = vcmp.gt.f32.partialorder %v1388_v48, 0.0 }
 0x176   :  { %v476_v52 = vsel %vm416_vm5, %v1382_v32, %v1299_v46  ;;  %v431_v53 = vmin.f32 %v376_v51, 0.0  ;;  %vm419_vm1 = vcmp.gt.f32.partialorder %v376_v51, 0.0 }
 0x177   :  { %v1876_v54 = vmul.f32 %v1873_v47, %v476_v52  ;;  %v475_v55 = vsel %vm415_vm12, %v356_v34, %v1298_v49  ;;  %v449_v56 = vmul.f32 1.442695, %v432_v50  ;;  %v1912_v50 = vld [vmem:[%s2210_s3] ss:$0 sm:$0xff]  ;;  %s1656_s3 = smov 32  }
 0x178   :  { %v1879_v57 = vmul.f32 %v1873_v47, %v475_v55  ;;  %v447_v58 = vmul.f32 1.442695, %v431_v53 }
 0x179   :  { %v519_v59 = vmin.f32 %v1876_v54, 0.0  ;;  %1484 = vpow2.f32 %v449_v56  ;;  %vm507_vm2 = vcmp.gt.f32.partialorder %v1876_v54, 0.0 }
 0x17a   :  { %v518_v60 = vmin.f32 %v1879_v57, 0.0  ;;  %1486 = vpow2.f32 %v447_v58  ;;  %vm506_vm3 = vcmp.gt.f32.partialorder %v1879_v57, 0.0 }
 0x17b   :  { %v1481_v61 = vpop.eup %1480  ;;  %v532_v62 = vmul.f32 1.442695, %v519_v59 }
 0x17c   :  { %v1483_v63 = vpop.eup %1482  ;;  %v530_v0 = vmul.f32 1.442695, %v518_v60  ;;  %v1301_v1 = vadd.f32 -1.0, %v1481_v61  ;;  %v1883_v4 = vpop.f32.mrb[6].mxu0 }
 0x17d   :  { %1488 = vpow2.f32 %v532_v62  ;;  %v1300_v5 = vadd.f32 -1.0, %v1483_v63  ;;  %v434_v6 = vmin.f32 %v1883_v4, 0.0  ;;  %v1886_v8 = vpop.f32.mrb[7].mxu0  ;;  %vm422_vm6 = vcmp.gt.f32.partialorder %v1883_v4, 0.0 }
 0x17e   :  { %1490 = vpow2.f32 %v530_v0  ;;  %v478_v17 = vsel %vm418_vm13, %v1385_v38, %v1301_v1  ;;  %v433_v18 = vmin.f32 %v1886_v8, 0.0  ;;  %vm421_vm7 = vcmp.gt.f32.partialorder %v1886_v8, 0.0 }
 0x17f   :  { %v1890_v21 = vmul.f32 %v1873_v47, %v478_v17  ;;  %v477_v22 = vsel %vm417_vm14, %v366_v40, %v1300_v5  ;;  %v453_v23 = vmul.f32 1.442695, %v434_v6 }
 0x180   :  { %v1893_v24 = vmul.f32 %v1873_v47, %v477_v22  ;;  %v451_v26 = vmul.f32 1.442695, %v433_v18 }
 0x181   :  { %v521_v27 = vmin.f32 %v1890_v21, 0.0  ;;  %1492 = vpow2.f32 %v453_v23  ;;  %vm509_vm8 = vcmp.gt.f32.partialorder %v1890_v21, 0.0 }
 0x182   :  { %v520_v28 = vmin.f32 %v1893_v24, 0.0  ;;  %1494 = vpow2.f32 %v451_v26  ;;  %vm508_vm9 = vcmp.gt.f32.partialorder %v1893_v24, 0.0 }
 0x183   :  { %v1485_v29 = vpop.eup %1484  ;;  %v536_v30 = vmul.f32 1.442695, %v521_v27 }
 0x184   :  { %v1487_v31 = vpop.eup %1486  ;;  %v534_v32 = vmul.f32 1.442695, %v520_v28  ;;  %v1303_v33 = vadd.f32 -1.0, %v1485_v29  ;;  %v1897_v34 = vpop.f32.mrb[8].mxu0 }
 0x185   :  { %1496 = vpow2.f32 %v536_v30  ;;  %v1302_v35 = vadd.f32 -1.0, %v1487_v31  ;;  %v436_v36 = vmin.f32 %v1897_v34, 0.0  ;;  %v1900_v37 = vpop.f32.mrb[9].mxu0  ;;  %vm424_vm10 = vcmp.gt.f32.partialorder %v1897_v34, 0.0 }
 0x186   :  { %1498 = vpow2.f32 %v534_v32  ;;  %v480_v38 = vsel %vm420_vm15, %v1388_v48, %v1303_v33  ;;  %v435_v39 = vmin.f32 %v1900_v37, 0.0  ;;  %vm423_vm11 = vcmp.gt.f32.partialorder %v1900_v37, 0.0 }
 0x187   :  { %v1489_v40 = vpop.eup %1488  ;;  %v1904_v41 = vmul.f32 %v1873_v47, %v480_v38  ;;  %v479_v42 = vsel %vm419_vm1, %v376_v51, %v1302_v35  ;;  %v457_v43 = vmul.f32 1.442695, %v436_v36 }
 0x188   :  { %v1491_v44 = vpop.eup %1490  ;;  %v1907_v45 = vmul.f32 %v1873_v47, %v479_v42  ;;  %v455_v46 = vmul.f32 1.442695, %v435_v39  ;;  %v1312_v49 = vadd.f32 -1.0, %v1489_v40 }
 0x189   :  { %v523_v48 = vmin.f32 %v1904_v41, 0.0  ;;  %1500 = vpow2.f32 %v457_v43  ;;  %v1311_v52 = vadd.f32 -1.0, %v1491_v44  ;;  %vm511_vm5 = vcmp.gt.f32.partialorder %v1904_v41, 0.0 }
 0x18a   :  { %v522_v51 = vmin.f32 %v1907_v45, 0.0  ;;  %1502 = vpow2.f32 %v455_v46  ;;  %v1918_v53 = vsel %vm507_vm2, %v1876_v54, %v1312_v49  ;;  %vm510_vm12 = vcmp.gt.f32.partialorder %v1907_v45, 0.0 }
 0x18b   :  { %v1493_v55 = vpop.eup %1492  ;;  %v540_v56 = vmul.f32 1.442695, %v523_v48  ;;  %v586_v58 = vmul.f32 %v1912_v50, %v1918_v53  ;;  %v1924_v59 = vsel %vm506_vm3, %v1879_v57, %v1311_v52 }
 0x18c   :  { %v1495_v60 = vpop.eup %1494  ;;  %v538_v61 = vmul.f32 1.442695, %v522_v51  ;;  %v1305_v62 = vadd.f32 -1.0, %v1493_v55  ;;  %v1926_v63 = vpop.f32.mrb[10].mxu0  ;;  %v585_v54 = vmul.f32 %v1912_v50, %v1924_v59 }
 0x18d   :  { %1504 = vpow2.f32 %v540_v56  ;;  %v1304_v0 = vadd.f32 -1.0, %v1495_v60  ;;  %v438_v1 = vmin.f32 %v1926_v63, 0.0  ;;  %v1932_v5 = vpop.f32.mrb[11].mxu0  ;;  %v601_v26 = vsel %vm597_vm4, %v586_v58, 0.0 }
 0x18e   :  { %1506 = vpow2.f32 %v538_v61  ;;  %v482_v57 = vsel %vm422_vm6, %v1883_v4, %v1305_v62  ;;  %v437_v6 = vmin.f32 %v1932_v5, 0.0  ;;  %602 = vadd.xlane.f32.xlu0 %v601_v26  ;;  %v598_v4 = vsel %vm597_vm4, %v585_v54, 0.0 }
 0x18f   :  { %v1497_v17 = vpop.eup %1496  ;;  %v1938_v18 = vmul.f32 %v1873_v47, %v482_v57  ;;  %v481_v22 = vsel %vm421_vm7, %v1886_v8, %v1304_v0  ;;  %v461_v23 = vmul.f32 1.442695, %v438_v1  ;;  %599 = vadd.xlane.f32.xlu1 %v598_v4  ;;  %vm426_vm13 = vcmp.gt.f32.partialorder %v1926_v63, 0.0 }
 0x190   :  { %v1499_v27 = vpop.eup %1498  ;;  %v1943_v28 = vmul.f32 %v1873_v47, %v481_v22  ;;  %v459_v29 = vmul.f32 1.442695, %v437_v6  ;;  %v1314_v30 = vadd.f32 -1.0, %v1497_v17  ;;  %vm425_vm14 = vcmp.gt.f32.partialorder %v1932_v5, 0.0 }
 0x191   :  { %v525_v31 = vmin.f32 %v1938_v18, 0.0  ;;  %1508 = vpow2.f32 %v461_v23  ;;  %v1313_v32 = vadd.f32 -1.0, %v1499_v27  ;;  %vm513_vm15 = vcmp.gt.f32.partialorder %v1938_v18, 0.0 }
 0x192   :  { %v524_v8 = vmin.f32 %v1943_v28, 0.0  ;;  %1510 = vpow2.f32 %v459_v29  ;;  %v1950_v33 = vsel %vm509_vm8, %v1890_v21, %v1314_v30  ;;  %vm512_vm1 = vcmp.gt.f32.partialorder %v1943_v28, 0.0 }
 0x193   :  { %v1501_v35 = vpop.eup %1500  ;;  %v544_v36 = vmul.f32 1.442695, %v525_v31  ;;  %v588_v38 = vmul.f32 %v1912_v50, %v1950_v33  ;;  %v1956_v39 = vsel %vm508_vm9, %v1893_v24, %v1313_v32 }
 0x194   :  { %v1503_v40 = vpop.eup %1502  ;;  %v542_v42 = vmul.f32 1.442695, %v524_v8  ;;  %v1307_v43 = vadd.f32 -1.0, %v1501_v35  ;;  %v587_v46 = vmul.f32 %v1912_v50, %v1956_v39 }
 0x195   :  { %1512 = vpow2.f32 %v544_v36  ;;  %v1306_v44 = vadd.f32 -1.0, %v1503_v40  ;;  %v607_v21 = vsel %vm597_vm4, %v588_v38, 0.0 }
 0x196   :  { %1514 = vpow2.f32 %v542_v42  ;;  %v484_v49 = vsel %vm424_vm10, %v1897_v34, %v1307_v43  ;;  %608 = vadd.xlane.f32.xlu1 %v607_v21  ;;  %v604_v60 = vsel %vm597_vm4, %v587_v46, 0.0  ;;  %v772_v46 = vshrl.u32 %v95_v19, 7 }
 0x197   :  { %v1505_v24 = vpop.eup %1504  ;;  %v503_v48 = vmul.f32 %v1873_v47, %v484_v49  ;;  %v483_v52 = vsel %vm423_vm11, %v1900_v37, %v1306_v44 }
 0x198   :  { %v1507_v51 = vpop.eup %1506  ;;  %v502_v55 = vmul.f32 %v1873_v47, %v483_v52  ;;  %v1316_v56 = vadd.f32 -1.0, %v1505_v24 }
 0x199   :  { %v527_v58 = vmin.f32 %v503_v48, 0.0  ;;  %v1315_v61 = vadd.f32 -1.0, %v1507_v51  ;;  %vm515_vm2 = vcmp.gt.f32.partialorder %v503_v48, 0.0 }
 0x19a   :  { %v526_v62 = vmin.f32 %v502_v55, 0.0  ;;  %605 = vadd.xlane.f32.xlu1 %v604_v60  ;;  %v1970_v34 = vsel %vm511_vm5, %v1904_v41, %v1316_v56  ;;  %vm514_vm3 = vcmp.gt.f32.partialorder %v502_v55, 0.0  ;;  %v2014_v56 = vadd.s32 80, %v772_v46 }
 0x19b   :  { %v1509_v54 = vpop.eup %1508  ;;  %v548_v0 = vmul.f32 1.442695, %v527_v58  ;;  %v590_v37 = vmul.f32 %v1912_v50, %v1970_v34  ;;  %v1976_v1 = vsel %vm510_vm12, %v1907_v45, %v1315_v61  ;;  %v1655_v61 = vmov 0.0|0.0  }
 0x19c   :  { %v1511_v57 = vpop.eup %1510  ;;  %v546_v6 = vmul.f32 1.442695, %v526_v62  ;;  %v1309_v17 = vadd.f32 -1.0, %v1509_v54  ;;  %v589_v22 = vmul.f32 %v1912_v50, %v1976_v1  ;;  %vm807_vm6 = vcmp.lt.s32.totalorder %v2014_v56, 83  ;;  %1427 = vmatprep.subr.bf16.mxu1 %v1655_v61  ;;  %v859_v62 = vpop.permute.xlu0 %858 }
 0x19d   :  { %1516 = vpow2.f32 %v548_v0  ;;  %v1308_v41 = vadd.f32 -1.0, %v1511_v57  ;;  %v613_v23 = vsel %vm597_vm4, %v590_v37, 0.0  ;;  %vm893_vm8 = vcmp.eq.s32.totalorder %v859_v62, %v1808_v20  ;;  %v862_v54 = vpop.permute.xlu1 %861 }
 0x19e   :  { %1518 = vpow2.f32 %v546_v6  ;;  %v486_v26 = vsel %vm426_vm13, %v1926_v63, %v1309_v17  ;;  %614 = vadd.xlane.f32.xlu0 %v613_v23  ;;  %v610_v45 = vsel %vm597_vm4, %v589_v22, 0.0  ;;  %v1336_v0 = vsel %vm893_vm8, 1.0, %v1654_v25 }
 0x19f   :  { %v1513_v27 = vpop.eup %1512  ;;  %v1986_v29 = vmul.f32 %v1873_v47, %v486_v26  ;;  %v485_v4 = vsel %vm425_vm14, %v1932_v5, %v1308_v41  ;;  %611 = vadd.xlane.f32.xlu1 %v610_v45  ;;  %vm894_vm9 = vcmp.eq.s32.totalorder %v862_v54, %v1808_v20 }
 0x1a0   :  { %v1515_v30 = vpop.eup %1514  ;;  %v504_v31 = vmul.f32 %v1873_v47, %v485_v4  ;;  %v1318_v32 = vadd.f32 -1.0, %v1513_v27  ;;  %v1337_v57 = vsel %vm894_vm9, 1.0, %v1654_v25  ;;  %v871_v23 = vpop.permute.xlu0 %870  ;;  %vm759_vm9 = vcmask 523264  }
 0x1a1   :  { %v1317_v8 = vadd.f32 -1.0, %v1515_v30  ;;  %v865_v6 = vpop.permute.xlu1 %864  ;;  %vm897_vm5 = vcmp.eq.s32.totalorder %v871_v23, %v1808_v20 }
 0x1a2   :  { %v528_v63 = vmin.f32 %v504_v31, 0.0  ;;  %v1992_v35 = vsel %vm513_vm15, %v1938_v18, %v1318_v32  ;;  %vm516_vm7 = vcmp.gt.f32.partialorder %v504_v31, 0.0  ;;  %vm895_vm10 = vcmp.eq.s32.totalorder %v865_v6, %v1808_v20 }
 0x1a3   :  { %v592_v36 = vmul.f32 %v1912_v50, %v1992_v35  ;;  %v1998_v38 = vsel %vm512_vm1, %v1943_v28, %v1317_v8  ;;  %v1338_v22 = vsel %vm895_vm10, 1.0, %v1654_v25  ;;  %v1340_v26 = vsel %vm897_vm5, 1.0, %v1654_v25 }
 0x1a4   :  { %v550_v5 = vmul.f32 1.442695, %v528_v63  ;;  %v591_v47 = vmul.f32 %v1912_v50, %v1998_v38  ;;  %v877_v27 = vpop.permute.xlu0 %876  ;;  %v529_v32 = vmin.f32 %v1986_v29, 0.0  ;;  %vm517_vm1 = vcmp.gt.f32.partialorder %v1986_v29, 0.0 }
 0x1a5   :  { %v619_v40 = vsel %vm597_vm4, %v592_v36, 0.0  ;;  %v868_v41 = vpop.permute.xlu1 %867  ;;  %vm899_vm13 = vcmp.eq.s32.totalorder %v877_v27, %v1808_v20  ;;  %vm763_vm10 = vcmask 785408  }
 0x1a6   :  { %1520 = vpow2.f32 %v550_v5  ;;  %620 = vadd.xlane.f32.xlu0 %v619_v40  ;;  %v616_v42 = vsel %vm597_vm4, %v591_v47, 0.0  ;;  %vm896_vm11 = vcmp.eq.s32.totalorder %v868_v41, %v1808_v20  ;;  %v552_v36 = vmul.f32 1.442695, %v529_v32 }
 0x1a7   :  { %v1517_v18 = vpop.eup %1516  ;;  %617 = vadd.xlane.f32.xlu1 %v616_v42 }
 0x1a8   :  { %v1519_v43 = vpop.eup %1518  ;;  %v1320_v44 = vadd.f32 -1.0, %v1517_v18  ;;  %v883_v8 = vpop.permute.xlu0 %882  ;;  %1522 = vpow2.f32 %v552_v36  ;;  %v2064_v18 = vstv %s2211_s4  ;;  %s2117_s4 = smov 0  }
 0x1a9   :  { %v1319_v21 = vadd.f32 -1.0, %v1519_v43  ;;  %v874_v45 = vpop.permute.xlu1 %873  ;;  %vm901_vm15 = vcmp.eq.s32.totalorder %v883_v8, %v1808_v20 }
 0x1aa   :  { %v2005_v28 = vsel %vm515_vm2, %v503_v48, %v1320_v44  ;;  %vm898_vm12 = vcmp.eq.s32.totalorder %v874_v45, %v1808_v20  ;;  %v1344_v5 = vsel %vm901_vm15, 1.0, %v1654_v25  ;;  %vm1659_vm2 = vmmov 0  }
 0x1ab   :  { %v594_v49 = vmul.f32 %v1912_v50, %v2005_v28  ;;  %v2009_v24 = vsel %vm514_vm3, %v502_v55, %v1319_v21  ;;  %v1341_v4 = vsel %vm898_vm12, 1.0, %v1654_v25  ;;  %1420 = vmatprep.mubr.msk.f32.mxu1 %vm1659_vm2, %v1654_v25  ;;  %vm75_vm3 = vcmask 256000  }
 0x1ac   :  { %v593_v52 = vmul.f32 %v1912_v50, %v2009_v24  ;;  %76 = vst.msk [vmem:[#allocation6] sm:$0x7] %vm75_vm3, %v1654_v25 }
 0x1ad   :  { %v625_v51 = vsel %vm597_vm4, %v594_v49, 0.0  ;;  %v880_v30 = vpop.permute.xlu1 %879 }
 0x1ae   :  { %626 = vadd.xlane.f32.xlu0 %v625_v51  ;;  %v622_v58 = vsel %vm597_vm4, %v593_v52, 0.0  ;;  %vm900_vm14 = vcmp.eq.s32.totalorder %v880_v30, %v1808_v20 }
 0x1af   :  { %623 = vadd.xlane.f32.xlu1 %v622_v58  ;;  %v1343_v63 = vsel %vm900_vm14, 1.0, %v1654_v25 }
 0x1b0   :  { %v1521_v19 = vpop.eup %1520 }
 0x1b1   :  { %v1321_v48 = vadd.f32 -1.0, %v1521_v19 }
 0x1b2   :  { %v1523_v47 = vpop.eup %1522 }
 0x1b3   :  { %v2018_v60 = vsel %vm516_vm7, %v504_v31, %v1321_v48  ;;  %v1342_v31 = vsel %vm899_vm13, 1.0, %v1654_v25  ;;  %v1322_v40 = vadd.f32 -1.0, %v1523_v47  ;;  %v941_v56 = vld [vmem:[#allocation6] sm:$0x7] }
 0x1b4   :  { %v2023_v55 = vsel %vm807_vm6, %v2018_v60, -inf  ;;  %v595_v37 = vmul.f32 %v1912_v50, %v2018_v60  ;;  %v1339_v50 = vsel %vm896_vm11, 1.0, %v1654_v25 }
 0x1b5   :  { %v577_v42 = vsel %vm517_vm1, %v1986_v29, %v1322_v40 }
 0x1b6   :  { %v628_v17 = vsel %vm597_vm4, %v595_v37, 0.0 }
 0x1c0   :  { %885 = vperm.xlu1 %1475, %v1784_v15  }
 0x1c4   :  { %888 = vperm.xlu0 %1474, %v1791_v16  }
 0x1e2   :  { %942 = vxpose.xlu0.b32.start [1/11] (short) (narrow) %v1336_v0, 8 }
 0x1e4   :  { %629 = vadd.xlane.f32.xlu1 %v628_v17 }
 0x1e6   :  { %943 = vxpose.xlu0.b32.cont [2/11] (short) (narrow) %v1337_v57, 8 }
 0x1ea   :  { %944 = vxpose.xlu0.b32.cont [3/11] (short) (narrow) %v1338_v22, 8 }
 0x1ee   :  { %945 = vxpose.xlu0.b32.cont [4/11] (short) (narrow) %v1339_v50, 8 }
 0x1f2   :  { %946 = vxpose.xlu0.b32.cont [5/11] (short) (narrow) %v1340_v26, 8 }
 0x1f5   :  { %723 = vrot.lane.b32.xlu1 %v1950_v33, %s1656_s3 }
 0x1f6   :  { %947 = vxpose.xlu0.b32.cont [6/11] (short) (narrow) %v1341_v4, 8 }
 0x1f9   :  { %725 = vrot.lane.b32.xlu1 %v1976_v1, %s1656_s3 }
 0x1fa   :  { %948 = vxpose.xlu0.b32.cont [7/11] (short) (narrow) %v1342_v31, 8 }
 0x1fd   :  { %727 = vrot.lane.b32.xlu1 %v1970_v34, %s1656_s3 }
 0x1fe   :  { %949 = vxpose.xlu0.b32.cont [8/11] (short) (narrow) %v1343_v63, 8 }
 0x201   :  { %735 = vrot.lane.b32.xlu1 %v1998_v38, %s1657_s30 }
 0x202   :  { %950 = vxpose.xlu0.b32.cont [9/11] (short) (narrow) %v1344_v5, 8 }
 0x205   :  { %737 = vrot.lane.b32.xlu1 %v1992_v35, %s1657_s30 }
 0x209   :  { %739 = vrot.lane.b32.xlu1 %v2009_v24, %s1657_s30 }
 0x20d   :  { %747 = vrot.lane.b32.xlu1 %v2005_v28, %s1658_s8 }
 0x211   :  { %749 = vrot.lane.b32.xlu1 %v2018_v60, %s1658_s8 }
 0x215   :  { %751 = vrot.lane.b32.xlu1 %v577_v42, %s1658_s8 }
 0x21b   :  { %v603_v43 = vpop.xlane.xlu0 %602 }
 0x21c   :  { %v637_v44 = vadd.f32 %v2064_v18, %v603_v43  ;;  %v600_v21 = vpop.xlane.xlu1 %599 }
 0x21d   :  { %v636_v46 = vadd.f32 %v2064_v18, %v600_v21 }
 0x21e   :  { %v1325_v49 = vmul.f32 -1.442695, %v637_v44 }
 0x21f   :  { %v1324_v52 = vmul.f32 -1.442695, %v636_v46 }
 0x220   :  { %1524 = vpow2.f32 %v1325_v49 }
 0x221   :  { %1526 = vpow2.f32 %v1324_v52 }
 0x223   :  { %v609_v29 = vpop.xlane.xlu1 %608 }
 0x224   :  { %v639_v51 = vadd.f32 %v2064_v18, %v609_v29 }
 0x226   :  { %v1327_v58 = vmul.f32 -1.442695, %v639_v51 }
 0x227   :  { %v606_v19 = vpop.xlane.xlu1 %605 }
 0x228   :  { %1528 = vpow2.f32 %v1327_v58  ;;  %v638_v48 = vadd.f32 %v2064_v18, %v606_v19 }
 0x22a   :  { %v1326_v62 = vmul.f32 -1.442695, %v638_v48  ;;  %v1525_v0 = vpop.eup %1524 }
 0x22b   :  { %v615_v54 = vpop.xlane.xlu0 %614  ;;  %v1527_v6 = vpop.eup %1526  ;;  %v685_v17 = vadd.f32 1.0, %v1525_v0 }
 0x22c   :  { %1530 = vpow2.f32 %v1326_v62  ;;  %v641_v37 = vadd.f32 %v2064_v18, %v615_v54  ;;  %v612_v57 = vpop.xlane.xlu1 %611  ;;  %v684_v41 = vadd.f32 1.0, %v1527_v6 }
 0x22d   :  { %v640_v22 = vadd.f32 %v2064_v18, %v612_v57  ;;  %1532 = vrcp.f32 %v685_v17 }
 0x22e   :  { %v1329_v23 = vmul.f32 -1.442695, %v641_v37  ;;  %1534 = vrcp.f32 %v684_v41 }
 0x22f   :  { %v1328_v50 = vmul.f32 -1.442695, %v640_v22 }
 0x230   :  { %1536 = vpow2.f32 %v1329_v23 }
 0x231   :  { %1538 = vpow2.f32 %v1328_v50 }
 0x232   :  { %v1529_v26 = vpop.eup %1528 }
 0x233   :  { %v687_v45 = vadd.f32 1.0, %v1529_v26  ;;  %v621_v27 = vpop.xlane.xlu0 %620 }
 0x234   :  { %v643_v4 = vadd.f32 %v2064_v18, %v621_v27  ;;  %v618_v30 = vpop.xlane.xlu1 %617 }
 0x235   :  { %v642_v31 = vadd.f32 %v2064_v18, %v618_v30  ;;  %1540 = vrcp.f32 %v687_v45 }
 0x236   :  { %v1531_v32 = vpop.eup %1530  ;;  %v1331_v8 = vmul.f32 -1.442695, %v643_v4 }
 0x237   :  { %v686_v63 = vadd.f32 1.0, %v1531_v32  ;;  %v1330_v36 = vmul.f32 -1.442695, %v642_v31  ;;  %v1533_v5 = vpop.eup %1532 }
 0x238   :  { %1542 = vpow2.f32 %v1331_v8  ;;  %v1535_v47 = vpop.eup %1534  ;;  %v810_v40 = vmul.f32 %v1533_v5, %v1918_v53 }
 0x239   :  { %1544 = vrcp.f32 %v686_v63  ;;  %v809_v44 = vmul.f32 %v1535_v47, %v1924_v59 }
 0x23a   :  { %1546 = vpow2.f32 %v1330_v36  ;;  %v1537_v42 = vpop.eup %1536 }
 0x23b   :  { %v627_v43 = vpop.xlane.xlu0 %626  ;;  %v1539_v21 = vpop.eup %1538  ;;  %v689_v46 = vadd.f32 1.0, %v1537_v42  ;;  %v1428_v58 = vpack.c.bf16 %v810_v40, %v809_v44 }
 0x23c   :  { %v645_v49 = vadd.f32 %v2064_v18, %v627_v43  ;;  %v624_v52 = vpop.xlane.xlu1 %623  ;;  %v688_v29 = vadd.f32 1.0, %v1539_v21 }
 0x23d   :  { %v644_v51 = vadd.f32 %v2064_v18, %v624_v52  ;;  %1548 = vrcp.f32 %v689_v46  ;;  %1429 = vmatpush3.bf16.msra.mxu1 %v1428_v58 }
 0x23e   :  { %v1333_v19 = vmul.f32 -1.442695, %v645_v49  ;;  %1550 = vrcp.f32 %v688_v29  ;;  %1430 = vmatprep.subr.bf16.mxu1 %v1655_v61 }
 0x23f   :  { %v1332_v48 = vmul.f32 -1.442695, %v644_v51  ;;  %v1541_v54 = vpop.eup %1540 }
 0x240   :  { %1552 = vpow2.f32 %v1333_v19  ;;  %v886_v62 = vpop.permute.xlu1 %885  ;;  %v812_v23 = vmul.f32 %v1541_v54, %v1950_v33 }
 0x241   :  { %1554 = vpow2.f32 %v1332_v48  ;;  %vm902_vm7 = vcmp.eq.s32.totalorder %v886_v62, %v1808_v20 }
 0x242   :  { %v1543_v0 = vpop.eup %1542  ;;  %v1345_v37 = vsel %vm902_vm7, 1.0, %v1654_v25 }
 0x243   :  { %v1545_v57 = vpop.eup %1544  ;;  %v691_v6 = vadd.f32 1.0, %v1543_v0  ;;  %v889_v17 = vpop.permute.xlu0 %888  ;;  %951 = vxpose.xlu0.b32.cont [10/11] (short) (narrow) %v1345_v37, 8 }
 0x244   :  { %v1547_v22 = vpop.eup %1546  ;;  %vm903_vm8 = vcmp.eq.s32.totalorder %v889_v17, %v1808_v20  ;;  %v811_v41 = vmul.f32 %v1545_v57, %v1956_v39 }
 0x245   :  { %1556 = vrcp.f32 %v691_v6  ;;  %v690_v50 = vadd.f32 1.0, %v1547_v22  ;;  %v1346_v26 = vsel %vm903_vm8, 1.0, %v1654_v25 }
 0x246   :  { %v939_v45 = vsel %vm807_vm6, %v1346_v26, 0.0  ;;  %v1431_v27 = vpack.c.bf16 %v812_v23, %v811_v41 }
 0x247   :  { %1558 = vrcp.f32 %v690_v50  ;;  %952 = vxpose.xlu0.b32.end [11/11] (short) (narrow) %v939_v45, 8  ;;  %v1549_v4 = vpop.eup %1548 }
 0x248   :  { %1432 = vmatpush3.bf16.msra.mxu1 %v1431_v27  ;;  %v1551_v30 = vpop.eup %1550  ;;  %v814_v20 = vmul.f32 %v1549_v4, %v1970_v34 }
 0x249   :  { %1433 = vmatprep.subr.bf16.mxu1 %v1655_v61  ;;  %v813_v32 = vmul.f32 %v1551_v30, %v1976_v1 }
 0x24a   :  { %v1553_v31 = vpop.eup %1552 }
 0x24b   :  { %v1555_v8 = vpop.eup %1554  ;;  %v693_v63 = vadd.f32 1.0, %v1553_v31  ;;  %v1434_v5 = vpack.c.bf16 %v814_v20, %v813_v32 }
 0x24c   :  { %v692_v36 = vadd.f32 1.0, %v1555_v8 }
 0x24d   :  { %1560 = vrcp.f32 %v693_v63  ;;  %1435 = vmatpush3.bf16.msra.mxu1 %v1434_v5 }
 0x24e   :  { %1562 = vrcp.f32 %v692_v36  ;;  %1436 = vmatprep.subr.bf16.mxu1 %v1655_v61 }
 0x24f   :  { %v1557_v47 = vpop.eup %1556 }
 0x250   :  { %v816_v40 = vmul.f32 %v1557_v47, %v1992_v35 }
 0x251   :  { %v1559_v42 = vpop.eup %1558 }
 0x252   :  { %v815_v43 = vmul.f32 %v1559_v42, %v1998_v38 }
 0x254   :  { %v1437_v44 = vpack.c.bf16 %v816_v40, %v815_v43 }
 0x256   :  { %1438 = vmatpush3.bf16.msra.mxu1 %v1437_v44 }
 0x257   :  { %v1561_v21 = vpop.eup %1560  ;;  %1439 = vmatprep.subr.bf16.mxu1 %v1655_v61 }
 0x258   :  { %v1563_v46 = vpop.eup %1562  ;;  %v818_v49 = vmul.f32 %v1561_v21, %v2005_v28 }
 0x259   :  { %v817_v52 = vmul.f32 %v1563_v46, %v2009_v24 }
 0x25b   :  { %v1440_v29 = vpack.c.bf16 %v818_v49, %v817_v52 }
 0x25d   :  { %1441 = vmatpush3.bf16.msra.mxu1 %v1440_v29 }
 0x25e   :  { %1418 = vmatprep.subr.mxu1 %v1654_v25 }
 0x271   :  { %v630_v51 = vpop.xlane.xlu1 %629 }
 0x272   :  { %v646_v58 = vadd.f32 %v2064_v18, %v630_v51 }
 0x274   :  { %v1334_v19 = vmul.f32 -1.442695, %v646_v58 }
 0x275   :  { %v724_v48 = vpop.permute.xlu1 %723 }
 0x276   :  { %1564 = vpow2.f32 %v1334_v19  ;;  %v756_v17 = vsel %vm597_vm4, %v1924_v59, %v724_v48 }
 0x279   :  { %v726_v62 = vpop.permute.xlu1 %725 }
 0x27a   :  { %v757_v50 = vsel %vm597_vm4, %v1918_v53, %v726_v62 }
 0x27d   :  { %v728_v54 = vpop.permute.xlu1 %727 }
 0x27e   :  { %v758_v4 = vsel %vm597_vm4, %v1956_v39, %v728_v54 }
 0x280   :  { %v1565_v0 = vpop.eup %1564 }
 0x281   :  { %v694_v37 = vadd.f32 1.0, %v1565_v0  ;;  %v736_v61 = vpop.permute.xlu1 %735 }
 0x282   :  { %v760_v22 = vsel %vm759_vm9, %v756_v17, %v736_v61 }
 0x283   :  { %1566 = vrcp.f32 %v694_v37 }
 0x285   :  { %v738_v57 = vpop.permute.xlu1 %737 }
 0x286   :  { %v761_v26 = vsel %vm759_vm9, %v757_v50, %v738_v57 }
 0x289   :  { %v740_v6 = vpop.permute.xlu1 %739 }
 0x28a   :  { %v762_v30 = vsel %vm759_vm9, %v758_v4, %v740_v6 }
 0x28d   :  { %v1567_v25 = vpop.eup %1566  ;;  %v748_v18 = vpop.permute.xlu1 %747 }
 0x28e   :  { %v764_v41 = vsel %vm763_vm10, %v760_v22, %v748_v18  ;;  %v819_v23 = vmul.f32 %v1567_v25, %v2018_v60 }
 0x28f   :  { %767 = vst [vmem:[#allocation4] sm:$0xff] %v764_v41 }
 0x290   :  { %1419 = vmatpush3.msk.msra.mxu1 %vm807_vm6, %v819_v23 }
 0x291   :  { %v750_v45 = vpop.permute.xlu1 %749 }
 0x292   :  { %v765_v27 = vsel %vm763_vm10, %v761_v26, %v750_v45 }
 0x293   :  { %768 = vst [vmem:[#allocation4 + $0x8] sm:$0xff] %v765_v27 }
 0x295   :  { %v752_v20 = vpop.permute.xlu1 %751 }
 0x296   :  { %v766_v60 = vsel %vm763_vm10, %v762_v30, %v752_v20 }
 0x297   :  { %769 = vst [vmem:[#allocation4 + $0x10] sm:$0xff] %v766_v60 }
 0x29f   :  { %v958_v31 = vpop.trf.xlu0 }
 0x2a0   :  { %1421 = vmatmul.mubr.msk.f32.vlgmr.msra.gmra.mrb[0].mxu1 %vm763_vm10, %v958_v31 }
 0x373   :  { %v1043_v32 = vpop.f32.mrb[0].mxu1 }
 0x374   :  { %v1047_v8 = vadd.f32 %v1043_v32, %v941_v56  ;;  %v1422_v63 = vpop.f32.mrb[1].mxu1 }
 0x376   :  { %1049 = vst.msk [vmem:[#allocation6] sm:$0x7] %vm75_vm3, %v1047_v8 }
 0x377 LB: > { %v1660_v36 = vmov 2   ;;  %v1068_v5 = vstv %s1648_s4  ;;  %v1661_v47 = vmov 0   ;;  %s1182_s10 = scalar_lea.vmem [#allocation8], %s1648_s4  ;;  %s1067_s4 = sadd.s32 1, %s1648_s4   ;;  %s1648_s4 = sphi %s2117_s4, %s1067_s4  }
 0x378   : > { %1569 = vset.pattern.permute.xlu1 %v1660_v36  ;;  %1568 = vset.pattern.permute.xlu0 %v1660_v36  ;;  %vm1071_vm6 = vcmp.eq.s32.totalorder %v1732_v7, %v1068_v5  ;;  %vm1069_vm11 = vcmp.eq.s32.totalorder %v1723_v3, %v1068_v5  ;;  %vm1073_vm5 = vcmp.eq.s32.totalorder %v1749_v10, %v1068_v5  ;;  %p1064_p0 = scmp.ge.s32.totalorder %s1067_s4, 3  }
 0x379   : > { %vm1070_vm12 = vcmp.eq.s32.totalorder %v1718_v2, %v1068_v5  ;;  %v1083_v40 = vsel %vm1071_vm6, 1, %v1661_v47  ;;  %v1081_v42 = vsel %vm1069_vm11, 1, %v1661_v47  ;;  %v1085_v43 = vsel %vm1073_vm5, 1, %v1661_v47  ;;  %s1662_s11 = smov (%p1064_p0), [#allocation6]   ;;  %s1663_s13 = smov (%p1064_p0), [#allocation4]  }
 0x37a   : > { %1100 = vperm.xlu1 %1569, %v1083_v40   ;;  %1094 = vperm.xlu0 %1568, %v1081_v42   ;;  %v1082_v44 = vsel %vm1070_vm12, 1, %v1661_v47  ;;  %vm1075_vm13 = vcmp.eq.s32.totalorder %v1763_v12, %v1068_v5  ;;  %vm1074_vm14 = vcmp.eq.s32.totalorder %v1756_v11, %v1068_v5  ;;  %vm1076_vm15 = vcmp.eq.s32.totalorder %v1770_v13, %v1068_v5  ;;  %s1221_s12 = sshll.u32 (%p1064_p0), %s1662_s11, 4  ;;  %s1208_s14 = sshll.u32 (%p1064_p0), %s1663_s13, 4  ;;  %s1222_s12 = int_to_ptr.vmem [resolvable:$true] %s1221_s12  ;;  %s2164_s14 = int_to_ptr.vmem [resolvable:$true] %s1208_s14 }
 0x37b   : > { %v1087_v21 = vsel %vm1075_vm13, 1, %v1661_v47  ;;  %v1086_v46 = vsel %vm1074_vm14, 1, %v1661_v47  ;;  %vm1072_vm1 = vcmp.eq.s32.totalorder %v1742_v9, %v1068_v5  ;;  %v1088_v49 = vsel %vm1076_vm15, 1, %v1661_v47  ;;  %s1570_s15 = scalar_lea.vmem (%p1064_p0), %s1222_s12, 64  ;;  %p1575_p2 = scmp.lt.s32.totalorder (%p1064_p0), %s1222_s12, %s1222_s12 }
 0x37c   : > { %v1084_v52 = vsel %vm1072_vm1, 1, %v1661_v47  ;;  %vm1078_vm2 = vcmp.eq.s32.totalorder %v1784_v15, %v1068_v5  ;;  %vm1077_vm3 = vcmp.eq.s32.totalorder %v1777_v14, %v1068_v5  ;;  %vm1079_vm7 = vcmp.eq.s32.totalorder %v1791_v16, %v1068_v5  ;;  %p1571_p1 = scmp.ne.s32.totalorder (%p1064_p0), %s1222_s12, %s1570_s15  ;;  %p1576_p3 = scmp.lt.s32.totalorder (%p1064_p0), %s1570_s15, %s1570_s15 }
 0x37d   : > { %v1090_v29 = vsel %vm1078_vm2, 1, %v1661_v47  ;;  %v1089_v51 = vsel %vm1077_vm3, 1, %v1661_v47  ;;  %v1091_v58 = vsel %vm1079_vm7, 1, %v1661_v47 }
 0x37e   : > { %1106 = vperm.xlu1 %1569, %v1085_v43   ;;  %1097 = vperm.xlu0 %1568, %v1082_v44   ;;  %p1577_p4 = por (%p1064_p0), %p1576_p3, %p1575_p2 }
 0x380   :  { %p1578_p5 = pnand (%p1064_p0), %p1577_p4, %p1571_p1 }
 0x382   : > { %1112 = vperm.xlu1 %1569, %v1087_v21   ;;  %1109 = vperm.xlu0 %1568, %v1086_v46  }
 0x386   : > { %1115 = vperm.xlu1 %1569, %v1088_v49   ;;  %1103 = vperm.xlu0 %1568, %v1084_v52  }
 0x38a   : > { %1121 = vperm.xlu1 %1569, %v1090_v29   ;;  %1118 = vperm.xlu0 %1568, %v1089_v51  }
 0x38e   : > { %1124 = vperm.xlu0 %1568, %v1091_v58  }
 0x3f9   : > { %v1101_v19 = vpop.permute.xlu1 %1100  ;;  %v1095_v48 = vpop.permute.xlu0 %1094 }
 0x3fa   : > { %vm1129_vm8 = vcmp.eq.s32.totalorder %v1095_v48, 1  ;;  %vm1131_vm6 = vcmp.eq.s32.totalorder %v1101_v19, 1 }
 0x3fb   : > { %v1141_v6 = vsel %vm1129_vm8, %v1924_v59, -inf  ;;  %v1143_v22 = vsel %vm1131_vm6, %v1956_v39, -inf }
 0x3fc   : > { %v1153_v18 = vsel %vm597_vm4, %v1141_v6, -inf  ;;  %v1155_v47 = vsel %vm597_vm4, %v1143_v22, -inf }
 0x3fd   : > { %v1107_v62 = vpop.permute.xlu1 %1106  ;;  %v1098_v54 = vpop.permute.xlu0 %1097 }
 0x3fe   : > { %vm1133_vm9 = vcmp.eq.s32.totalorder %v1107_v62, 1  ;;  %vm1130_vm11 = vcmp.eq.s32.totalorder %v1098_v54, 1 }
 0x3ff   : > { %v1145_v17 = vsel %vm1133_vm9, %v1976_v1, -inf  ;;  %v1142_v41 = vsel %vm1130_vm11, %v1918_v53, -inf }
 0x400   : > { %v1157_v45 = vsel %vm597_vm4, %v1145_v17, -inf  ;;  %v1154_v31 = vsel %vm597_vm4, %v1142_v41, -inf }
 0x401   : > { %v1113_v0 = vpop.permute.xlu1 %1112  ;;  %v1110_v37 = vpop.permute.xlu0 %1109  ;;  %v1158_v63 = vmax.f32 %v1153_v18, %v1157_v45 }
 0x402   : > { %vm1134_vm10 = vcmp.eq.s32.totalorder %v1110_v37, 1  ;;  %vm1135_vm5 = vcmp.eq.s32.totalorder %v1113_v0, 1 }
 0x403   : > { %v1146_v25 = vsel %vm1134_vm10, %v1970_v34, -inf  ;;  %v1147_v23 = vsel %vm1135_vm5, %v1998_v38, -inf }
 0x404   : > { %v1159_v27 = vsel %vm597_vm4, %v1146_v25, -inf  ;;  %v1161_v56 = vsel %vm597_vm4, %v1147_v23, -inf }
 0x405   : > { %v1116_v61 = vpop.permute.xlu1 %1115  ;;  %v1104_v57 = vpop.permute.xlu0 %1103  ;;  %v1160_v36 = vmax.f32 %v1154_v31, %v1159_v27  ;;  %v1162_v43 = vmax.f32 %v1155_v47, %v1161_v56 }
 0x406   : > { %vm1136_vm12 = vcmp.eq.s32.totalorder %v1116_v61, 1  ;;  %vm1132_vm13 = vcmp.eq.s32.totalorder %v1104_v57, 1  ;;  %v1183_v61 = vld [vmem:[%s1182_s10] sm:$0x1] }
 0x407   : > { %v1148_v4 = vsel %vm1136_vm12, %v1992_v35, -inf  ;;  %v1144_v30 = vsel %vm1132_vm13, %v1950_v33, -inf }
 0x408   : > { %v1163_v40 = vsel %vm597_vm4, %v1148_v4, -inf  ;;  %v1156_v42 = vsel %vm597_vm4, %v1144_v30, -inf }
 0x409   : > { %v1122_v50 = vpop.permute.xlu1 %1121  ;;  %v1119_v26 = vpop.permute.xlu0 %1118  ;;  %v1164_v52 = vmax.f32 %v1156_v42, %v1163_v40 }
 0x40a   : > { %vm1138_vm14 = vcmp.eq.s32.totalorder %v1122_v50, 1  ;;  %vm1137_vm15 = vcmp.eq.s32.totalorder %v1119_v26, 1 }
 0x40b   : > { %v1150_v20 = vsel %vm1138_vm14, %v2005_v28, -inf  ;;  %v1149_v60 = vsel %vm1137_vm15, %v2009_v24, -inf }
 0x40c   : > { %v1167_v32 = vsel %vm597_vm4, %v1150_v20, -inf  ;;  %v1165_v8 = vsel %vm597_vm4, %v1149_v60, -inf }
 0x40d   : > { %v1125_v5 = vpop.permute.xlu0 %1124  ;;  %v1168_v44 = vmax.f32 %v1160_v36, %v1167_v32  ;;  %v1166_v21 = vmax.f32 %v1158_v63, %v1165_v8 }
 0x40e   : > { %vm1139_vm1 = vcmp.eq.s32.totalorder %v1125_v5, 1 }
 0x40f   : > { %v1151_v46 = vsel %vm1139_vm1, %v2023_v55, -inf  ;;  %v1173_v51 = vmax.f32 %v1166_v21, %v1168_v44 }
 0x410   : > { %v1169_v49 = vsel %vm597_vm4, %v1151_v46, -inf }
 0x411   : > { %v1170_v29 = vmax.f32 %v1162_v43, %v1169_v49 }
 0x413   : > { %v1174_v58 = vmax.f32 %v1170_v29, %v1164_v52 }
 0x415   : > { %v1175_v19 = vmax.f32 %v1173_v51, %v1174_v58 }
 0x417   : > { %v1176_v48 = vrot.slane %v1175_v19, 4 }
 0x419   : > { %v1177_v62 = vmax.f32 %v1175_v19, %v1176_v48 }
 0x41b   : > { %v1178_v54 = vrot.slane %v1177_v62, 2 }
 0x41d   : > { %v1179_v0 = vmax.f32 %v1177_v62, %v1178_v54 }
 0x41f   : > { %v1180_v37 = vrot.slane %v1179_v0, 1  ;;  %1066 = sbr.rel (!%p1064_p0) target bundleno = 887 (0x377), region = 111 }
 0x421   : > { %v1181_v57 = vmax.f32 %v1179_v0, %v1180_v37 }
 0x423   : > { %v1184_v6 = vmax.f32 %v1183_v61, %v1181_v57 }
 0x425   : > { %1186 = vst.msk [vmem:[%s1182_s10] sm:$0x1] %vm77_vm0, %v1184_v6 }
 0x42c   :  { %v1190_v17 = vld [vmem:[#allocation8] sm:$0x1]  ;;  %v1191_v25 = vld [vmem:[#allocation8 + $0x1] sm:$0x1]  ;;  %v1192_v22 = vld [vmem:[#allocation8 + $0x2] sm:$0x1] }
 0x42d   :  { %vm1193_vm2 = vcmp.eq.f32.partialorder %v1190_v17, -inf  ;;  %vm1194_vm3 = vcmp.eq.f32.partialorder %v1191_v25, -inf  ;;  %vm1195_vm7 = vcmp.eq.f32.partialorder %v1192_v22, -inf }
 0x42e   :  { %v1196_v18 = vsel %vm1193_vm2, 0.0, %v1190_v17  ;;  %v1197_v41 = vsel %vm1194_vm3, 0.0, %v1191_v25  ;;  %v1198_v23 = vsel %vm1195_vm7, 0.0, %v1192_v22 }
 0x42f   :  { %1200 = vst.msk [vmem:[#allocation8] sm:$0x1] %vm77_vm0, %v1196_v18  ;;  %1201 = vst.msk [vmem:[#allocation8 + $0x1] sm:$0x1] %vm77_vm0, %v1197_v41 }
 0x430   :  { %1202 = vst.msk [vmem:[#allocation8 + $0x2] sm:$0x1] %vm77_vm0, %v1198_v23 }
 0x431   :  { %1581 = shalt.err (!%p1578_p5)
}
 0x432   :  { %s1582_s18 = scalar_lea.hbm %s2213_s6, 64 }
 0x433   :  { %p1583_p6 = scmp.ne.s32.totalorder %s2213_s6, %s1582_s18  ;;  %p1586_p7 = scmp.lt.u32.totalorder %s1582_s18, %s2213_s6 }
 0x435   :  { %p1588_p8 = pnand %p1586_p7, %p1583_p6 }
 0x437   :  { %1591 = shalt.err (!%p1588_p8)
}
 0x438   :  { %1224 = dma.vmem_to_hbm [thread:$0]  %s1222_s12, 64, %s2213_s6, [#allocation7]  }
 0x439   :  { %s1592_s25 = scalar_lea.vmem %s2164_s14, 384  ;;  %p1597_p10 = scmp.lt.s32.totalorder %s2164_s14, %s2164_s14 }
 0x43a   :  { %p1593_p9 = scmp.ne.s32.totalorder %s2164_s14, %s1592_s25  ;;  %p1598_p11 = scmp.lt.s32.totalorder %s1592_s25, %s1592_s25 }
 0x43c   :  { %p1599_p12 = por %p1598_p11, %p1597_p10 }
 0x43e   :  { %p1600_p13 = pnand %p1599_p12, %p1593_p9 }
 0x440   :  { %1603 = shalt.err (!%p1600_p13)
}
 0x441   :  { %s1604_s0 = scalar_lea.hbm %s2212_s5, 384 }
 0x442   :  { %p1605_p0 = scmp.ne.s32.totalorder %s2212_s5, %s1604_s0  ;;  %p1608_p1 = scmp.lt.u32.totalorder %s1604_s0, %s2212_s5 }
 0x444   :  { %p1610_p2 = pnand %p1608_p1, %p1605_p0 }
 0x446   :  { %1613 = shalt.err (!%p1610_p2)
}
 0x447   :  { %s1664_s6 = smov 128   ;;  %s1665_s30 = smov 8  }
 0x448   :  { %1214 = dma.vmem_to_hbm [thread:$0]  %s2164_s14, 384, %s2212_s5, [#allocation5], %s1664_s6, %s1664_s6, %s1665_s30  }
 0x449   :  { %s1666_s9 = smov [#allocation8]  }
 0x44a   :  { %s1230_s4 = sshll.u32 %s1666_s9, 4  ;;  %s1231_s4 = int_to_ptr.vmem [resolvable:$true] %s1230_s4 }
 0x44b   :  { %s1614_s10 = scalar_lea.vmem %s1231_s4, 48  ;;  %s1618_s11 = scalar_lea.vmem %s1231_s4, 64 }
 0x44c   :  { %p1615_p3 = scmp.ne.s32.totalorder %s1231_s4, %s1614_s10  ;;  %p1619_p4 = scmp.lt.s32.totalorder %s1231_s4, %s1231_s4 }
 0x44d   :  { %p1620_p5 = scmp.lt.s32.totalorder %s1618_s11, %s1614_s10 }
 0x44f   :  { %p1621_p6 = por %p1620_p5, %p1619_p4 }
 0x451   :  { %p1622_p7 = pnand %p1621_p6, %p1615_p3 }
 0x453   :  { %1625 = shalt.err (!%p1622_p7)
}
 0x454   :  { %s1626_s15 = scalar_lea.hbm %s2214_s7, 48 }
 0x455   :  { %p1627_p8 = scmp.ne.s32.totalorder %s2214_s7, %s1626_s15  ;;  %p1630_p9 = scmp.lt.u32.totalorder %s1626_s15, %s2214_s7 }
 0x457   :  { %p1632_p10 = pnand %p1630_p9, %p1627_p8 }
 0x459   :  { %1635 = shalt.err (!%p1632_p10)
}
 0x45a   :  { %s1667_s18 = smov 16   ;;  %s1668_s19 = smov 1  }
 0x45b   :  { %1236 = dma.vmem_to_hbm [thread:$0]  %s1231_s4, 48, %s2214_s7, [#allocation7], %s1667_s18, %s1667_s18, %s1668_s19  }
 0x45c   :  { %1642 = dma.done.wait [#allocation5], 384  }
 0x45d   :  { %1643 = vsyncadd [#allocation5], 4294966912 }
 0x45e   :  { %1644 = dma.done.wait [#allocation7], 112  }
 0x45f   :  { %1645 = vsyncadd [#allocation7], 4294967184 }
 0x460   :  { %1246 = vsyncpa [#allocation5], 1 }
 0x461   :  { %1247 = vsyncpa [#allocation7], 1 }

</bundles_post_ra>
